<compile_context>
chip_gen: v6e
topology: v6e:2x2x1
jax: 0.10.0
libtpu: 0.0.40
codegen_flags: <defaults>
</compile_context>

<pallas_src>
import jax
import jax.numpy as jnp
from jax import lax
from jax.experimental import pallas as pl
from jax.experimental.pallas import tpu as pltpu

# ---- static model config (small shapes implied by the module) ----
N = 2                       # batch
CIN = 1                     # input_channels (PyTorch default)
COUT = 4                    # hidden_channels
H = W = 16                  # spatial
KH = KW = 3
HO, WO = H - KH + 1, W - KW + 1     # valid conv, stride 1 -> 14 x 14
TAPS = CIN * KH * KW                # 9
WIDE = HO * W                       # 224: per-channel conv output in row-padded form
FLAT = COUT * HO * WO               # 784
HID = 32                            # MLP hidden width
OUT = 8                             # MLP output width
XPAD = CIN * H * W + W              # 272 >= last tap offset (34) + WIDE (224)
LN_EPS = 1e-5                       # nn.LayerNorm default eps


def fused_kernel(x_ref, wc_ref, bc_ref, w1w_ref, b1_ref, g_ref, bb_ref,
                 w2_ref, b2_ref, o_ref, p_scr, h_scr):
    """Whole forward pass in one kernel invocation.

    x_ref  : (N, XPAD)        flattened + zero-padded images (VMEM)
    wc_ref : (COUT, TAPS)     conv weight, OIHW flattened per out channel
    bc_ref : (COUT, 1)        conv bias (column)
    w1w_ref: (COUT, WIDE, HID) first Linear weight, re-packed to the wide layout
                               (rows for the 2 dead columns per spatial row are 0)
    b1/g/bb: (1, HID)          Linear1 bias, LayerNorm gamma, LayerNorm beta
    w2_ref : (HID, OUT), b2_ref: (1, OUT)
    o_ref  : (N, OUT)
    p_scr  : (TAPS, WIDE) VMEM scratch (im2col patches)
    h_scr  : (N, HID)     VMEM scratch (pre-norm hidden rows)
    """
    wc = wc_ref[...]                       # (COUT, TAPS)
    bc = bc_ref[...]                       # (COUT, 1)

    for n in range(N):                     # static unroll, batch = 2
        # --- im2col: 9 shifted, contiguous 224-wide slices of the flat image ---
        for ci in range(CIN):
            for kh in range(KH):
                for kw in range(KW):
                    k = (ci * KH + kh) * KW + kw
                    off = ci * H * W + kh * W + kw
                    p_scr[k:k + 1, :] = x_ref[n:n + 1, off:off + WIDE]

        # --- Conv2d as one MXU matmul + bias, then Blocks (= ReLU) ---
        conv = jnp.dot(wc, p_scr[...], preferred_element_type=jnp.float32) + bc
        conv = jnp.maximum(conv, 0.0)      # (COUT, WIDE); dead cols are zero-weighted

        # --- Linear(784 -> 32): contract each channel row against its W1 block ---
        acc = jnp.zeros((1, HID), dtype=jnp.float32)
        for co in range(COUT):
            acc = acc + jnp.dot(conv[co:co + 1, :], w1w_ref[co],
                                preferred_element_type=jnp.float32)
        h_scr[n:n + 1, :] = acc

    h = h_scr[...] + b1_ref[...]           # (N, HID)

    # --- LayerNorm(32): one-pass variance, affine, then ReLU ---
    mu = jnp.mean(h, axis=-1, keepdims=True)
    var = jnp.maximum(jnp.mean(h * h, axis=-1, keepdims=True) - mu * mu, 0.0)
    h = (h - mu) * lax.rsqrt(var + LN_EPS)
    h = jnp.maximum(h * g_ref[...] + bb_ref[...], 0.0)

    # --- Linear(32 -> 8) ---
    o_ref[...] = jnp.dot(h, w2_ref[...], preferred_element_type=jnp.float32) + b2_ref[...]


def _cost_estimate():
    flops = 2 * N * (COUT * TAPS * WIDE + COUT * WIDE * HID + HID * OUT)
    bytes_accessed = 4 * (N * XPAD + COUT * TAPS + COUT + COUT * WIDE * HID
                          + 3 * HID + HID * OUT + OUT + N * OUT)
    return pl.CostEstimate(flops=flops, transcendentals=N,
                           bytes_accessed=bytes_accessed)


@jax.jit
def candidate_architecture_forward(x, params):
    (w_conv, b_conv, w1, b1, gamma, beta, w2, b2) = params

    # Host-side (XLA, fused under jit) repacking into kernel-friendly layouts.
    x_pad = jnp.pad(x.reshape(N, CIN * H * W), ((0, 0), (0, XPAD - CIN * H * W)))
    wc = w_conv.reshape(COUT, TAPS)
    bc = b_conv.reshape(COUT, 1)
    # W1 rows follow torch.flatten order co*196 + oh*14 + ow; re-pack to the
    # row-padded wide order (co, oh*16 + ow) with zero rows for ow in {14, 15}.
    w1w = w1.reshape(COUT, HO, WO, HID)
    w1w = jnp.pad(w1w, ((0, 0), (0, 0), (0, W - WO), (0, 0)))
    w1w = w1w.reshape(COUT, WIDE, HID)

    return pl.pallas_call(
        fused_kernel,
        out_shape=jax.ShapeDtypeStruct((N, OUT), jnp.float32),
        scratch_shapes=[pltpu.VMEM((TAPS, WIDE), jnp.float32),
                        pltpu.VMEM((N, HID), jnp.float32)],
        cost_estimate=_cost_estimate(),
    )(x_pad, wc, bc, w1w, b1, gamma, beta, w2, b2)


def reference_forward(x, params):
    """Pure-JAX reference with identical semantics, for validation."""
    (w_conv, b_conv, w1, b1, gamma, beta, w2, b2) = params
    y = lax.conv_general_dilated(
        x, w_conv, window_strides=(1, 1), padding="VALID",
        dimension_numbers=("NCHW", "OIHW", "NCHW"))
    y = y + b_conv[None, :, None, None]
    y = jnp.maximum(y, 0.0)                 # Blocks = ReLU
    y = y.reshape(N, -1)                    # torch.flatten(x, 1)
    h = y @ w1 + b1
    mu = jnp.mean(h, axis=-1, keepdims=True)
    var = jnp.mean((h - mu) ** 2, axis=-1, keepdims=True)
    h = (h - mu) / jnp.sqrt(var + LN_EPS) * gamma + beta
    h = jnp.maximum(h, 0.0)
    return h @ w2 + b2


if __name__ == "__main__":
    key = jax.random.PRNGKey(0)
    kx, kc, kcb, k1, k1b, k2, k2b = jax.random.split(key, 7)

    # input (NCHW, like PyTorch)
    x = jax.random.normal(kx, (N, CIN, H, W), dtype=jnp.float32)

    # deterministic parameter init (shapes from the module's __init__)
    w_conv = 0.1 * jax.random.normal(kc, (COUT, CIN, KH, KW), dtype=jnp.float32)  # OIHW
    b_conv = 0.1 * jax.random.normal(kcb, (COUT,), dtype=jnp.float32)
    w1 = 0.05 * jax.random.normal(k1, (FLAT, HID), dtype=jnp.float32)             # [in, out]
    b1 = 0.05 * jax.random.normal(k1b, (1, HID), dtype=jnp.float32)
    gamma = jnp.ones((1, HID), dtype=jnp.float32)                                 # LayerNorm weight
    beta = jnp.zeros((1, HID), dtype=jnp.float32)                                 # LayerNorm bias
    w2 = 0.05 * jax.random.normal(k2, (HID, OUT), dtype=jnp.float32)
    b2 = 0.05 * jax.random.normal(k2b, (1, OUT), dtype=jnp.float32)

    params = (w_conv, b_conv, w1, b1, gamma, beta, w2, b2)

    out = candidate_architecture_forward(x, params)
    out = jax.block_until_ready(out)

    ref = jax.block_until_ready(reference_forward(x, params))
    assert out.shape == (N, OUT)
    assert jnp.allclose(out, ref, atol=1e-4, rtol=1e-4), "mismatch vs pure-JAX reference"

    print("KERNEL_OK")
</pallas_src>

<mosaic_0001>
module attributes {stable_mosaic.version = 11 : i64} {
  func.func @fused_kernel(%arg0: memref<2x272xf32, #tpu.memory_space<vmem>>, %arg1: memref<4x9xf32, #tpu.memory_space<vmem>>, %arg2: memref<4x1xf32, #tpu.memory_space<vmem>>, %arg3: memref<4x224x32xf32, #tpu.memory_space<vmem>>, %arg4: memref<1x32xf32, #tpu.memory_space<vmem>>, %arg5: memref<1x32xf32, #tpu.memory_space<vmem>>, %arg6: memref<1x32xf32, #tpu.memory_space<vmem>>, %arg7: memref<32x8xf32, #tpu.memory_space<vmem>>, %arg8: memref<1x8xf32, #tpu.memory_space<vmem>>, %arg9: memref<2x8xf32, #tpu.memory_space<vmem>>, %arg10: memref<9x224xf32, #tpu.memory_space<vmem>>, %arg11: memref<2x32xf32, #tpu.memory_space<vmem>>) attributes {dimension_semantics = [], scalar_prefetch = 0 : i64, scratch_operands = 2 : i64, tpu.core_type = #tpu.core_type<tc>} {
    %c0 = arith.constant 0 : index
    %c0_0 = arith.constant 0 : index
    %0 = vector.load %arg1[%c0, %c0_0] : memref<4x9xf32, #tpu.memory_space<vmem>>, vector<4x9xf32>
    %c0_1 = arith.constant 0 : index
    %c0_2 = arith.constant 0 : index
    %1 = vector.load %arg2[%c0_1, %c0_2] : memref<4x1xf32, #tpu.memory_space<vmem>>, vector<4x1xf32>
    %c0_3 = arith.constant 0 : index
    %c0_4 = arith.constant 0 : index
    %2 = vector.load %arg0[%c0_3, %c0_4] : memref<2x272xf32, #tpu.memory_space<vmem>>, vector<1x224xf32>
    %c0_5 = arith.constant 0 : index
    %c0_6 = arith.constant 0 : index
    %3 = vector.load %arg10[%c0_5, %c0_6] : memref<9x224xf32, #tpu.memory_space<vmem>>, vector<1x224xf32>
    tpu.vector_store %arg10[%c0_5, %c0_6], %2 {strides = array<i32>} : memref<9x224xf32, #tpu.memory_space<vmem>>, vector<1x224xf32>,
    %c0_7 = arith.constant 0 : index
    %c1 = arith.constant 1 : index
    %4 = vector.load %arg0[%c0_7, %c1] : memref<2x272xf32, #tpu.memory_space<vmem>>, vector<1x224xf32>
    %c1_8 = arith.constant 1 : index
    %c0_9 = arith.constant 0 : index
    %5 = vector.load %arg10[%c1_8, %c0_9] : memref<9x224xf32, #tpu.memory_space<vmem>>, vector<1x224xf32>
    tpu.vector_store %arg10[%c1_8, %c0_9], %4 {strides = array<i32>} : memref<9x224xf32, #tpu.memory_space<vmem>>, vector<1x224xf32>,
    %c0_10 = arith.constant 0 : index
    %c2 = arith.constant 2 : index
    %6 = vector.load %arg0[%c0_10, %c2] : memref<2x272xf32, #tpu.memory_space<vmem>>, vector<1x224xf32>
    %c2_11 = arith.constant 2 : index
    %c0_12 = arith.constant 0 : index
    %7 = vector.load %arg10[%c2_11, %c0_12] : memref<9x224xf32, #tpu.memory_space<vmem>>, vector<1x224xf32>
    tpu.vector_store %arg10[%c2_11, %c0_12], %6 {strides = array<i32>} : memref<9x224xf32, #tpu.memory_space<vmem>>, vector<1x224xf32>,
    %c0_13 = arith.constant 0 : index
    %c16 = arith.constant 16 : index
    %8 = vector.load %arg0[%c0_13, %c16] : memref<2x272xf32, #tpu.memory_space<vmem>>, vector<1x224xf32>
    %c3 = arith.constant 3 : index
    %c0_14 = arith.constant 0 : index
    %9 = vector.load %arg10[%c3, %c0_14] : memref<9x224xf32, #tpu.memory_space<vmem>>, vector<1x224xf32>
    tpu.vector_store %arg10[%c3, %c0_14], %8 {strides = array<i32>} : memref<9x224xf32, #tpu.memory_space<vmem>>, vector<1x224xf32>,
    %c0_15 = arith.constant 0 : index
    %c17 = arith.constant 17 : index
    %10 = vector.load %arg0[%c0_15, %c17] : memref<2x272xf32, #tpu.memory_space<vmem>>, vector<1x224xf32>
    %c4 = arith.constant 4 : index
    %c0_16 = arith.constant 0 : index
    %11 = vector.load %arg10[%c4, %c0_16] : memref<9x224xf32, #tpu.memory_space<vmem>>, vector<1x224xf32>
    tpu.vector_store %arg10[%c4, %c0_16], %10 {strides = array<i32>} : memref<9x224xf32, #tpu.memory_space<vmem>>, vector<1x224xf32>,
    %c0_17 = arith.constant 0 : index
    %c18 = arith.constant 18 : index
    %12 = vector.load %arg0[%c0_17, %c18] : memref<2x272xf32, #tpu.memory_space<vmem>>, vector<1x224xf32>
    %c5 = arith.constant 5 : index
    %c0_18 = arith.constant 0 : index
    %13 = vector.load %arg10[%c5, %c0_18] : memref<9x224xf32, #tpu.memory_space<vmem>>, vector<1x224xf32>
    tpu.vector_store %arg10[%c5, %c0_18], %12 {strides = array<i32>} : memref<9x224xf32, #tpu.memory_space<vmem>>, vector<1x224xf32>,
    %c0_19 = arith.constant 0 : index
    %c32 = arith.constant 32 : index
    %14 = vector.load %arg0[%c0_19, %c32] : memref<2x272xf32, #tpu.memory_space<vmem>>, vector<1x224xf32>
    %c6 = arith.constant 6 : index
    %c0_20 = arith.constant 0 : index
    %15 = vector.load %arg10[%c6, %c0_20] : memref<9x224xf32, #tpu.memory_space<vmem>>, vector<1x224xf32>
    tpu.vector_store %arg10[%c6, %c0_20], %14 {strides = array<i32>} : memref<9x224xf32, #tpu.memory_space<vmem>>, vector<1x224xf32>,
    %c0_21 = arith.constant 0 : index
    %c33 = arith.constant 33 : index
    %16 = vector.load %arg0[%c0_21, %c33] : memref<2x272xf32, #tpu.memory_space<vmem>>, vector<1x224xf32>
    %c7 = arith.constant 7 : index
    %c0_22 = arith.constant 0 : index
    %17 = vector.load %arg10[%c7, %c0_22] : memref<9x224xf32, #tpu.memory_space<vmem>>, vector<1x224xf32>
    tpu.vector_store %arg10[%c7, %c0_22], %16 {strides = array<i32>} : memref<9x224xf32, #tpu.memory_space<vmem>>, vector<1x224xf32>,
    %c0_23 = arith.constant 0 : index
    %c34 = arith.constant 34 : index
    %18 = vector.load %arg0[%c0_23, %c34] : memref<2x272xf32, #tpu.memory_space<vmem>>, vector<1x224xf32>
    %c8 = arith.constant 8 : index
    %c0_24 = arith.constant 0 : index
    %19 = vector.load %arg10[%c8, %c0_24] : memref<9x224xf32, #tpu.memory_space<vmem>>, vector<1x224xf32>
    tpu.vector_store %arg10[%c8, %c0_24], %18 {strides = array<i32>} : memref<9x224xf32, #tpu.memory_space<vmem>>, vector<1x224xf32>,
    %c0_25 = arith.constant 0 : index
    %c0_26 = arith.constant 0 : index
    %20 = vector.load %arg10[%c0_25, %c0_26] : memref<9x224xf32, #tpu.memory_space<vmem>>, vector<9x224xf32>
    %cst = arith.constant dense<0.000000e+00> : vector<4x224xf32>
    %21 = tpu.matmul %0, %20, %cst {dimension_numbers = #tpu.dot_dimension_numbers<[1], [0], [0], [1], [0, 0, 1, 1], [], []>} : vector<4x9xf32>, vector<9x224xf32>, vector<4x224xf32> -> vector<4x224xf32>
    %22 = vector.broadcast %1 : vector<4x1xf32> to vector<4x224xf32>
    %23 = arith.addf %21, %22 : vector<4x224xf32>
    %cst_27 = arith.constant 0.000000e+00 : f32
    %24 = vector.broadcast %cst_27 : f32 to vector<4x224xf32>
    %25 = arith.maximumf %23, %24 : vector<4x224xf32>
    %cst_28 = arith.constant 0.000000e+00 : f32
    %26 = vector.broadcast %cst_28 : f32 to vector<1x32xf32>
    %27 = vector.extract_strided_slice %25 {offsets = [0, 0], sizes = [1, 224], strides = [1, 1]} : vector<4x224xf32> to vector<1x224xf32>
    %c0_29 = arith.constant 0 : index
    %c0_30 = arith.constant 0 : index
    %c0_31 = arith.constant 0 : index
    %28 = vector.load %arg3[%c0_29, %c0_30, %c0_31] : memref<4x224x32xf32, #tpu.memory_space<vmem>>, vector<1x224x32xf32>
    %29 = vector.shape_cast %28 : vector<1x224x32xf32> to vector<224x32xf32>
    %cst_32 = arith.constant dense<0.000000e+00> : vector<1x32xf32>
    %30 = tpu.matmul %27, %29, %cst_32 {dimension_numbers = #tpu.dot_dimension_numbers<[1], [0], [0], [1], [0, 0, 1, 1], [], []>} : vector<1x224xf32>, vector<224x32xf32>, vector<1x32xf32> -> vector<1x32xf32>
    %31 = arith.addf %26, %30 : vector<1x32xf32>
    %32 = vector.extract_strided_slice %25 {offsets = [1, 0], sizes = [1, 224], strides = [1, 1]} : vector<4x224xf32> to vector<1x224xf32>
    %c1_33 = arith.constant 1 : index
    %c0_34 = arith.constant 0 : index
    %c0_35 = arith.constant 0 : index
    %33 = vector.load %arg3[%c1_33, %c0_34, %c0_35] : memref<4x224x32xf32, #tpu.memory_space<vmem>>, vector<1x224x32xf32>
    %34 = vector.shape_cast %33 : vector<1x224x32xf32> to vector<224x32xf32>
    %cst_36 = arith.constant dense<0.000000e+00> : vector<1x32xf32>
    %35 = tpu.matmul %32, %34, %cst_36 {dimension_numbers = #tpu.dot_dimension_numbers<[1], [0], [0], [1], [0, 0, 1, 1], [], []>} : vector<1x224xf32>, vector<224x32xf32>, vector<1x32xf32> -> vector<1x32xf32>
    %36 = arith.addf %31, %35 : vector<1x32xf32>
    %37 = vector.extract_strided_slice %25 {offsets = [2, 0], sizes = [1, 224], strides = [1, 1]} : vector<4x224xf32> to vector<1x224xf32>
    %c2_37 = arith.constant 2 : index
    %c0_38 = arith.constant 0 : index
    %c0_39 = arith.constant 0 : index
    %38 = vector.load %arg3[%c2_37, %c0_38, %c0_39] : memref<4x224x32xf32, #tpu.memory_space<vmem>>, vector<1x224x32xf32>
    %39 = vector.shape_cast %38 : vector<1x224x32xf32> to vector<224x32xf32>
    %cst_40 = arith.constant dense<0.000000e+00> : vector<1x32xf32>
    %40 = tpu.matmul %37, %39, %cst_40 {dimension_numbers = #tpu.dot_dimension_numbers<[1], [0], [0], [1], [0, 0, 1, 1], [], []>} : vector<1x224xf32>, vector<224x32xf32>, vector<1x32xf32> -> vector<1x32xf32>
    %41 = arith.addf %36, %40 : vector<1x32xf32>
    %42 = vector.extract_strided_slice %25 {offsets = [3, 0], sizes = [1, 224], strides = [1, 1]} : vector<4x224xf32> to vector<1x224xf32>
    %c3_41 = arith.constant 3 : index
    %c0_42 = arith.constant 0 : index
    %c0_43 = arith.constant 0 : index
    %43 = vector.load %arg3[%c3_41, %c0_42, %c0_43] : memref<4x224x32xf32, #tpu.memory_space<vmem>>, vector<1x224x32xf32>
    %44 = vector.shape_cast %43 : vector<1x224x32xf32> to vector<224x32xf32>
    %cst_44 = arith.constant dense<0.000000e+00> : vector<1x32xf32>
    %45 = tpu.matmul %42, %44, %cst_44 {dimension_numbers = #tpu.dot_dimension_numbers<[1], [0], [0], [1], [0, 0, 1, 1], [], []>} : vector<1x224xf32>, vector<224x32xf32>, vector<1x32xf32> -> vector<1x32xf32>
    %46 = arith.addf %41, %45 : vector<1x32xf32>
    %c0_45 = arith.constant 0 : index
    %c0_46 = arith.constant 0 : index
    %47 = vector.load %arg11[%c0_45, %c0_46] : memref<2x32xf32, #tpu.memory_space<vmem>>, vector<1x32xf32>
    tpu.vector_store %arg11[%c0_45, %c0_46], %46 {strides = array<i32>} : memref<2x32xf32, #tpu.memory_space<vmem>>, vector<1x32xf32>,
    %c1_47 = arith.constant 1 : index
    %c0_48 = arith.constant 0 : index
    %48 = vector.load %arg0[%c1_47, %c0_48] : memref<2x272xf32, #tpu.memory_space<vmem>>, vector<1x224xf32>
    %c0_49 = arith.constant 0 : index
    %c0_50 = arith.constant 0 : index
    %49 = vector.load %arg10[%c0_49, %c0_50] : memref<9x224xf32, #tpu.memory_space<vmem>>, vector<1x224xf32>
    tpu.vector_store %arg10[%c0_49, %c0_50], %48 {strides = array<i32>} : memref<9x224xf32, #tpu.memory_space<vmem>>, vector<1x224xf32>,
    %c1_51 = arith.constant 1 : index
    %c1_52 = arith.constant 1 : index
    %50 = vector.load %arg0[%c1_51, %c1_52] : memref<2x272xf32, #tpu.memory_space<vmem>>, vector<1x224xf32>
    %c1_53 = arith.constant 1 : index
    %c0_54 = arith.constant 0 : index
    %51 = vector.load %arg10[%c1_53, %c0_54] : memref<9x224xf32, #tpu.memory_space<vmem>>, vector<1x224xf32>
    tpu.vector_store %arg10[%c1_53, %c0_54], %50 {strides = array<i32>} : memref<9x224xf32, #tpu.memory_space<vmem>>, vector<1x224xf32>,
    %c1_55 = arith.constant 1 : index
    %c2_56 = arith.constant 2 : index
    %52 = vector.load %arg0[%c1_55, %c2_56] : memref<2x272xf32, #tpu.memory_space<vmem>>, vector<1x224xf32>
    %c2_57 = arith.constant 2 : index
    %c0_58 = arith.constant 0 : index
    %53 = vector.load %arg10[%c2_57, %c0_58] : memref<9x224xf32, #tpu.memory_space<vmem>>, vector<1x224xf32>
    tpu.vector_store %arg10[%c2_57, %c0_58], %52 {strides = array<i32>} : memref<9x224xf32, #tpu.memory_space<vmem>>, vector<1x224xf32>,
    %c1_59 = arith.constant 1 : index
    %c16_60 = arith.constant 16 : index
    %54 = vector.load %arg0[%c1_59, %c16_60] : memref<2x272xf32, #tpu.memory_space<vmem>>, vector<1x224xf32>
    %c3_61 = arith.constant 3 : index
    %c0_62 = arith.constant 0 : index
    %55 = vector.load %arg10[%c3_61, %c0_62] : memref<9x224xf32, #tpu.memory_space<vmem>>, vector<1x224xf32>
    tpu.vector_store %arg10[%c3_61, %c0_62], %54 {strides = array<i32>} : memref<9x224xf32, #tpu.memory_space<vmem>>, vector<1x224xf32>,
    %c1_63 = arith.constant 1 : index
    %c17_64 = arith.constant 17 : index
    %56 = vector.load %arg0[%c1_63, %c17_64] : memref<2x272xf32, #tpu.memory_space<vmem>>, vector<1x224xf32>
    %c4_65 = arith.constant 4 : index
    %c0_66 = arith.constant 0 : index
    %57 = vector.load %arg10[%c4_65, %c0_66] : memref<9x224xf32, #tpu.memory_space<vmem>>, vector<1x224xf32>
    tpu.vector_store %arg10[%c4_65, %c0_66], %56 {strides = array<i32>} : memref<9x224xf32, #tpu.memory_space<vmem>>, vector<1x224xf32>,
    %c1_67 = arith.constant 1 : index
    %c18_68 = arith.constant 18 : index
    %58 = vector.load %arg0[%c1_67, %c18_68] : memref<2x272xf32, #tpu.memory_space<vmem>>, vector<1x224xf32>
    %c5_69 = arith.constant 5 : index
    %c0_70 = arith.constant 0 : index
    %59 = vector.load %arg10[%c5_69, %c0_70] : memref<9x224xf32, #tpu.memory_space<vmem>>, vector<1x224xf32>
    tpu.vector_store %arg10[%c5_69, %c0_70], %58 {strides = array<i32>} : memref<9x224xf32, #tpu.memory_space<vmem>>, vector<1x224xf32>,
    %c1_71 = arith.constant 1 : index
    %c32_72 = arith.constant 32 : index
    %60 = vector.load %arg0[%c1_71, %c32_72] : memref<2x272xf32, #tpu.memory_space<vmem>>, vector<1x224xf32>
    %c6_73 = arith.constant 6 : index
    %c0_74 = arith.constant 0 : index
    %61 = vector.load %arg10[%c6_73, %c0_74] : memref<9x224xf32, #tpu.memory_space<vmem>>, vector<1x224xf32>
    tpu.vector_store %arg10[%c6_73, %c0_74], %60 {strides = array<i32>} : memref<9x224xf32, #tpu.memory_space<vmem>>, vector<1x224xf32>,
    %c1_75 = arith.constant 1 : index
    %c33_76 = arith.constant 33 : index
    %62 = vector.load %arg0[%c1_75, %c33_76] : memref<2x272xf32, #tpu.memory_space<vmem>>, vector<1x224xf32>
    %c7_77 = arith.constant 7 : index
    %c0_78 = arith.constant 0 : index
    %63 = vector.load %arg10[%c7_77, %c0_78] : memref<9x224xf32, #tpu.memory_space<vmem>>, vector<1x224xf32>
    tpu.vector_store %arg10[%c7_77, %c0_78], %62 {strides = array<i32>} : memref<9x224xf32, #tpu.memory_space<vmem>>, vector<1x224xf32>,
    %c1_79 = arith.constant 1 : index
    %c34_80 = arith.constant 34 : index
    %64 = vector.load %arg0[%c1_79, %c34_80] : memref<2x272xf32, #tpu.memory_space<vmem>>, vector<1x224xf32>
    %c8_81 = arith.constant 8 : index
    %c0_82 = arith.constant 0 : index
    %65 = vector.load %arg10[%c8_81, %c0_82] : memref<9x224xf32, #tpu.memory_space<vmem>>, vector<1x224xf32>
    tpu.vector_store %arg10[%c8_81, %c0_82], %64 {strides = array<i32>} : memref<9x224xf32, #tpu.memory_space<vmem>>, vector<1x224xf32>,
    %c0_83 = arith.constant 0 : index
    %c0_84 = arith.constant 0 : index
    %66 = vector.load %arg10[%c0_83, %c0_84] : memref<9x224xf32, #tpu.memory_space<vmem>>, vector<9x224xf32>
    %cst_85 = arith.constant dense<0.000000e+00> : vector<4x224xf32>
    %67 = tpu.matmul %0, %66, %cst_85 {dimension_numbers = #tpu.dot_dimension_numbers<[1], [0], [0], [1], [0, 0, 1, 1], [], []>} : vector<4x9xf32>, vector<9x224xf32>, vector<4x224xf32> -> vector<4x224xf32>
    %68 = vector.broadcast %1 : vector<4x1xf32> to vector<4x224xf32>
    %69 = arith.addf %67, %68 : vector<4x224xf32>
    %cst_86 = arith.constant 0.000000e+00 : f32
    %70 = vector.broadcast %cst_86 : f32 to vector<4x224xf32>
    %71 = arith.maximumf %69, %70 : vector<4x224xf32>
    %cst_87 = arith.constant 0.000000e+00 : f32
    %72 = vector.broadcast %cst_87 : f32 to vector<1x32xf32>
    %73 = vector.extract_strided_slice %71 {offsets = [0, 0], sizes = [1, 224], strides = [1, 1]} : vector<4x224xf32> to vector<1x224xf32>
    %c0_88 = arith.constant 0 : index
    %c0_89 = arith.constant 0 : index
    %c0_90 = arith.constant 0 : index
    %74 = vector.load %arg3[%c0_88, %c0_89, %c0_90] : memref<4x224x32xf32, #tpu.memory_space<vmem>>, vector<1x224x32xf32>
    %75 = vector.shape_cast %74 : vector<1x224x32xf32> to vector<224x32xf32>
    %cst_91 = arith.constant dense<0.000000e+00> : vector<1x32xf32>
    %76 = tpu.matmul %73, %75, %cst_91 {dimension_numbers = #tpu.dot_dimension_numbers<[1], [0], [0], [1], [0, 0, 1, 1], [], []>} : vector<1x224xf32>, vector<224x32xf32>, vector<1x32xf32> -> vector<1x32xf32>
    %77 = arith.addf %72, %76 : vector<1x32xf32>
    %78 = vector.extract_strided_slice %71 {offsets = [1, 0], sizes = [1, 224], strides = [1, 1]} : vector<4x224xf32> to vector<1x224xf32>
    %c1_92 = arith.constant 1 : index
    %c0_93 = arith.constant 0 : index
    %c0_94 = arith.constant 0 : index
    %79 = vector.load %arg3[%c1_92, %c0_93, %c0_94] : memref<4x224x32xf32, #tpu.memory_space<vmem>>, vector<1x224x32xf32>
    %80 = vector.shape_cast %79 : vector<1x224x32xf32> to vector<224x32xf32>
    %cst_95 = arith.constant dense<0.000000e+00> : vector<1x32xf32>
    %81 = tpu.matmul %78, %80, %cst_95 {dimension_numbers = #tpu.dot_dimension_numbers<[1], [0], [0], [1], [0, 0, 1, 1], [], []>} : vector<1x224xf32>, vector<224x32xf32>, vector<1x32xf32> -> vector<1x32xf32>
    %82 = arith.addf %77, %81 : vector<1x32xf32>
    %83 = vector.extract_strided_slice %71 {offsets = [2, 0], sizes = [1, 224], strides = [1, 1]} : vector<4x224xf32> to vector<1x224xf32>
    %c2_96 = arith.constant 2 : index
    %c0_97 = arith.constant 0 : index
    %c0_98 = arith.constant 0 : index
    %84 = vector.load %arg3[%c2_96, %c0_97, %c0_98] : memref<4x224x32xf32, #tpu.memory_space<vmem>>, vector<1x224x32xf32>
    %85 = vector.shape_cast %84 : vector<1x224x32xf32> to vector<224x32xf32>
    %cst_99 = arith.constant dense<0.000000e+00> : vector<1x32xf32>
    %86 = tpu.matmul %83, %85, %cst_99 {dimension_numbers = #tpu.dot_dimension_numbers<[1], [0], [0], [1], [0, 0, 1, 1], [], []>} : vector<1x224xf32>, vector<224x32xf32>, vector<1x32xf32> -> vector<1x32xf32>
    %87 = arith.addf %82, %86 : vector<1x32xf32>
    %88 = vector.extract_strided_slice %71 {offsets = [3, 0], sizes = [1, 224], strides = [1, 1]} : vector<4x224xf32> to vector<1x224xf32>
    %c3_100 = arith.constant 3 : index
    %c0_101 = arith.constant 0 : index
    %c0_102 = arith.constant 0 : index
    %89 = vector.load %arg3[%c3_100, %c0_101, %c0_102] : memref<4x224x32xf32, #tpu.memory_space<vmem>>, vector<1x224x32xf32>
    %90 = vector.shape_cast %89 : vector<1x224x32xf32> to vector<224x32xf32>
    %cst_103 = arith.constant dense<0.000000e+00> : vector<1x32xf32>
    %91 = tpu.matmul %88, %90, %cst_103 {dimension_numbers = #tpu.dot_dimension_numbers<[1], [0], [0], [1], [0, 0, 1, 1], [], []>} : vector<1x224xf32>, vector<224x32xf32>, vector<1x32xf32> -> vector<1x32xf32>
    %92 = arith.addf %87, %91 : vector<1x32xf32>
    %c1_104 = arith.constant 1 : index
    %c0_105 = arith.constant 0 : index
    %93 = vector.load %arg11[%c1_104, %c0_105] : memref<2x32xf32, #tpu.memory_space<vmem>>, vector<1x32xf32>
    tpu.vector_store %arg11[%c1_104, %c0_105], %92 {strides = array<i32>} : memref<2x32xf32, #tpu.memory_space<vmem>>, vector<1x32xf32>,
    %c0_106 = arith.constant 0 : index
    %c0_107 = arith.constant 0 : index
    %94 = vector.load %arg11[%c0_106, %c0_107] : memref<2x32xf32, #tpu.memory_space<vmem>>, vector<2x32xf32>
    %c0_108 = arith.constant 0 : index
    %c0_109 = arith.constant 0 : index
    %95 = vector.load %arg4[%c0_108, %c0_109] : memref<1x32xf32, #tpu.memory_space<vmem>>, vector<1x32xf32>
    %96 = vector.broadcast %95 : vector<1x32xf32> to vector<2x32xf32>
    %97 = arith.addf %94, %96 : vector<2x32xf32>
    %cst_110 = arith.constant dense<0.000000e+00> : vector<2xf32>
    %98 = vector.multi_reduction <add>, %97, %cst_110 [1] : vector<2x32xf32> to vector<2xf32>
    %99 = vector.shape_cast %98 : vector<2xf32> to vector<2x1xf32>
    %cst_111 = arith.constant 3.200000e+01 : f32
    %100 = vector.broadcast %cst_111 : f32 to vector<2x1xf32>
    %101 = arith.divf %99, %100 : vector<2x1xf32>
    %102 = arith.mulf %97, %97 : vector<2x32xf32>
    %cst_112 = arith.constant dense<0.000000e+00> : vector<2xf32>
    %103 = vector.multi_reduction <add>, %102, %cst_112 [1] : vector<2x32xf32> to vector<2xf32>
    %104 = vector.shape_cast %103 : vector<2xf32> to vector<2x1xf32>
    %cst_113 = arith.constant 3.200000e+01 : f32
    %105 = vector.broadcast %cst_113 : f32 to vector<2x1xf32>
    %106 = arith.divf %104, %105 : vector<2x1xf32>
    %107 = arith.mulf %101, %101 : vector<2x1xf32>
    %108 = arith.subf %106, %107 : vector<2x1xf32>
    %cst_114 = arith.constant 0.000000e+00 : f32
    %109 = vector.broadcast %cst_114 : f32 to vector<2x1xf32>
    %110 = arith.maximumf %108, %109 : vector<2x1xf32>
    %111 = vector.broadcast %101 : vector<2x1xf32> to vector<2x32xf32>
    %112 = arith.subf %97, %111 : vector<2x32xf32>
    %cst_115 = arith.constant 9.99999974E-6 : f32
    %113 = vector.broadcast %cst_115 : f32 to vector<2x1xf32>
    %114 = arith.addf %110, %113 : vector<2x1xf32>
    %115 = math.rsqrt %114 : vector<2x1xf32>
    %116 = vector.broadcast %115 : vector<2x1xf32> to vector<2x32xf32>
    %117 = arith.mulf %112, %116 : vector<2x32xf32>
    %c0_116 = arith.constant 0 : index
    %c0_117 = arith.constant 0 : index
    %118 = vector.load %arg5[%c0_116, %c0_117] : memref<1x32xf32, #tpu.memory_space<vmem>>, vector<1x32xf32>
    %119 = vector.broadcast %118 : vector<1x32xf32> to vector<2x32xf32>
    %120 = arith.mulf %117, %119 : vector<2x32xf32>
    %c0_118 = arith.constant 0 : index
    %c0_119 = arith.constant 0 : index
    %121 = vector.load %arg6[%c0_118, %c0_119] : memref<1x32xf32, #tpu.memory_space<vmem>>, vector<1x32xf32>
    %122 = vector.broadcast %121 : vector<1x32xf32> to vector<2x32xf32>
    %123 = arith.addf %120, %122 : vector<2x32xf32>
    %cst_120 = arith.constant 0.000000e+00 : f32
    %124 = vector.broadcast %cst_120 : f32 to vector<2x32xf32>
    %125 = arith.maximumf %123, %124 : vector<2x32xf32>
    %c0_121 = arith.constant 0 : index
    %c0_122 = arith.constant 0 : index
    %126 = vector.load %arg7[%c0_121, %c0_122] : memref<32x8xf32, #tpu.memory_space<vmem>>, vector<32x8xf32>
    %cst_123 = arith.constant dense<0.000000e+00> : vector<2x8xf32>
    %127 = tpu.matmul %125, %126, %cst_123 {dimension_numbers = #tpu.dot_dimension_numbers<[1], [0], [0], [1], [0, 0, 1, 1], [], []>} : vector<2x32xf32>, vector<32x8xf32>, vector<2x8xf32> -> vector<2x8xf32>
    %c0_124 = arith.constant 0 : index
    %c0_125 = arith.constant 0 : index
    %128 = vector.load %arg8[%c0_124, %c0_125] : memref<1x8xf32, #tpu.memory_space<vmem>>, vector<1x8xf32>
    %129 = vector.broadcast %128 : vector<1x8xf32> to vector<2x8xf32>
    %130 = arith.addf %127, %129 : vector<2x8xf32>
    %c0_126 = arith.constant 0 : index
    %c0_127 = arith.constant 0 : index
    %131 = vector.load %arg9[%c0_126, %c0_127] : memref<2x8xf32, #tpu.memory_space<vmem>>, vector<2x8xf32>
    tpu.vector_store %arg9[%c0_126, %c0_127], %130 {strides = array<i32>} : memref<2x8xf32, #tpu.memory_space<vmem>>, vector<2x8xf32>,
    return
  }
}

</mosaic_0001>

<bundles_post_ra>
// kernel: candidate_architecture_forward.1
= control target key start
LH: loop header
LB: loop body
LE: loop exit
PB: predicated region body
PF: predicated region fallthrough
CT: control target
= control target key end

     0   :  { %s1608_s11 = smov 94   ;;  %s1609_s14 = smov 126   ;;  %v36_v4 = vlaneseq  ;;  %s2882_s0 = inlined_call_operand.vmem [shape: f32[2,272], index: 0, kind: input, shape index: {}]   ;;  %s2883_s1 = inlined_call_operand.vmem [shape: f32[4,9], index: 1, kind: input, shape index: {}]   ;;  %s2884_s2 = inlined_call_operand.vmem [shape: f32[4,1], index: 2, kind: input, shape index: {}]   ;;  %s2885_s3 = inlined_call_operand.vmem [shape: f32[4,224,32], index: 3, kind: input, shape index: {}]   ;;  %s2886_s4 = inlined_call_operand.vmem [shape: f32[1,32], index: 4, kind: input, shape index: {}]   ;;  %s2887_s5 = inlined_call_operand.vmem [shape: f32[1,32], index: 5, kind: input, shape index: {}]   ;;  %s2888_s6 = inlined_call_operand.vmem [shape: f32[1,32], index: 6, kind: input, shape index: {}]   ;;  %s2889_s7 = inlined_call_operand.vmem [shape: f32[32,8], index: 7, kind: input, shape index: {}]   ;;  %s2890_s8 = inlined_call_operand.vmem [shape: f32[1,8], index: 8, kind: input, shape index: {}]   ;;  %s2891_s9 = inlined_call_operand.hbm [shape: f32[2,8], index: 9, kind: output, shape index: {}]  }
   0x1   :  { %v119_v0 = vld [vmem:[%s2882_s0] ss:$2 sm:$0x7]  ;;  %s1610_s19 = smov 127   ;;  %s1611_s22 = smov 112  }
   0x2   :  { %121 = vrot.lane.b32.xlu0 %v119_v0, %s1608_s11  ;;  %v53_v1 = vld [vmem:[%s2882_s0] ss:$2 sm:$0x3] }
   0x3   :  { %55 = vrot.lane.b32.xlu1 %v53_v1, %s1609_s14  ;;  %v42_v2 = vld [vmem:[%s2882_s0] ss:$2 sm:$0x3] }
   0x4   :  { %v64_v3 = vld [vmem:[%s2882_s0] ss:$2 sm:$0x3] }
   0x5   :  { %v86_v5 = vld [vmem:[%s2882_s0] ss:$2 sm:$0x3] }
   0x6   :  { %44 = vrot.lane.b32.xlu0 %v42_v2, %s1610_s19  ;;  %v75_v6 = vld [vmem:[%s2882_s0] ss:$2 sm:$0x3] }
   0x7   :  { %66 = vrot.lane.b32.xlu1 %v64_v3, %s1611_s22 }
   0x8   :  { %14 = vsyncpa [#allocation5], 0  ;;  %vm1692_vm0 = vcmp.lt.s32.totalorder %v36_v4, 224  ;;  %v35_v8 = vld [vmem:[%s2882_s0] ss:$2 sm:$0x3] }
   0x9   :  { %40 = vst.msk [vmem:[#allocation2] ss:$8 sm:$0x3] %vm1692_vm0, %v35_v8  ;;  %s1612_s27 = smov 111   ;;  %s1613_s28 = smov 110   ;;  %v2897_v11 = vmov 0.0  }
   0xa   :  { %77 = vrot.lane.b32.xlu0 %v75_v6, %s1612_s27  ;;  %v97_v9 = vld [vmem:[%s2882_s0] ss:$2 sm:$0x3]  ;;  %s1614_s13 = smov 96   ;;  %214 = vmatprep.mubr.f32.mxu1 %v2897_v11  ;;  %s1616_s15 = smov 95   ;;  %v1617_v13 = vmov 0  }
   0xb   :  { %88 = vrot.lane.b32.xlu1 %v86_v5, %s1613_s28  ;;  %v108_v10 = vld [vmem:[%s2882_s0] ss:$2 sm:$0x7]  ;;  %359 = vmatprep.subr.mxu0 %v2897_v11  ;;  %v1458_v14 = vld [vmem:[%s2882_s0 + $0x1] ss:$2 sm:$0x7] }
   0xc   :  { %v34_v12 = vld [vmem:[%s2884_s2] sm:$0xf]  ;;  %1583 = vset.pattern.permute.xlu0 %v1617_v13  ;;  %v1726_v16 = vld [vmem:[%s2885_s3 + $0x78] sm:$0xff]  ;;  %v1735_v18 = vld [vmem:[%s2885_s3 + $0x70] sm:$0xff]  ;;  %vm124_vm1 = vcmask 769024   ;;  %vm58_vm2 = vcmask 1031168  }
   0xd   :  { %v1452_v15 = vld [vmem:[%s2882_s0 + $0x1] ss:$2 sm:$0x3]  ;;  %360 = vmatpush1.msra.mxu0 %v1726_v16  ;;  %v1741_v19 = vld [vmem:[%s2885_s3 + $0x68] sm:$0xff]  ;;  %v1763_v23 = vld [vmem:[%s2885_s3 + $0x58] sm:$0xff]  ;;  %vm47_vm3 = vcmask 1039360  }
   0xe   :  { %99 = vrot.lane.b32.xlu0 %v97_v9, %s1614_s13  ;;  %v1451_v17 = vld [vmem:[%s2882_s0 + $0x1] ss:$2 sm:$0x3]  ;;  %361 = vmatprep.subr.mxu0 %v2897_v11  ;;  %v1775_v25 = vld [vmem:[%s2885_s3 + $0x50] sm:$0xff]  ;;  %v1785_v27 = vld [vmem:[%s2885_s3 + $0x48] sm:$0xff]  ;;  %vm69_vm4 = vcmask 916480  }
   0xf   :  { %110 = vrot.lane.b32.xlu1 %v108_v10, %s1616_s15  ;;  %362 = vmatpush1.msra.mxu0 %v1735_v18  ;;  %v1454_v20 = vld [vmem:[%s2882_s0 + $0x1] ss:$2 sm:$0x3]  ;;  %v1804_v30 = vld [vmem:[%s2885_s3 + $0x38] sm:$0xff]  ;;  %v1812_v31 = vld [vmem:[%s2885_s3 + $0x30] sm:$0xff]  ;;  %vm80_vm5 = vcmask 908288  }
  0x10   :  { %363 = vmatprep.subr.mxu0 %v2897_v11  ;;  %v1753_v21 = vld [vmem:[%s2885_s3 + $0x60] sm:$0xff]  ;;  %v1819_v32 = vld [vmem:[%s2885_s3 + $0x28] sm:$0xff]  ;;  %v1833_v34 = vld [vmem:[%s2885_s3 + $0x18] sm:$0xff]  ;;  %vm91_vm6 = vcmask 900096   ;;  %vm143_vm7 = vcmask 1040384   ;;  %vm102_vm8 = vcmask 785408  }
  0x11   :  { %v1453_v22 = vld [vmem:[%s2882_s0 + $0x1] ss:$2 sm:$0x3]  ;;  %364 = vmatpush1.msra.mxu0 %v1741_v19  ;;  %v1840_v35 = vld [vmem:[%s2885_s3 + $0x10] sm:$0xff]  ;;  %v1847_v36 = vld [vmem:[%s2885_s3 + $0x8] sm:$0xff]  ;;  %vm113_vm9 = vcmask 777216  }
  0x12   :  { %136 = vperm.xlu0 %1583, %v34_v12   ;;  %365 = vmatprep.subr.mxu0 %v2897_v11  ;;  %v1456_v24 = vld [vmem:[%s2882_s0 + $0x1] ss:$2 sm:$0x3]  ;;  %v1861_v38 = vld [vmem:[%s2885_s3 + $0xd8] sm:$0xff]  ;;  %v1868_v39 = vld [vmem:[%s2885_s3 + $0xd0] sm:$0xff]  ;;  %vm139_vm10 = vcmask 72704  }
  0x13   :  { %710 = vrot.lane.b32.xlu1 %v1458_v14, %s1608_s11  ;;  %366 = vmatpush1.msra.mxu0 %v1753_v21  ;;  %v1455_v26 = vld [vmem:[%s2882_s0 + $0x1] ss:$2 sm:$0x3]  ;;  %v1875_v40 = vld [vmem:[%s2885_s3 + $0xc8] sm:$0xff]  ;;  %v1889_v42 = vld [vmem:[%s2885_s3 + $0xb8] sm:$0xff]  ;;  %vm639_vm11 = vcmask 253952  }
  0x14   :  { %367 = vmatprep.subr.mxu0 %v2897_v11  ;;  %v1794_v28 = vld [vmem:[%s2885_s3 + $0x40] sm:$0xff]  ;;  %v1896_v43 = vld [vmem:[%s2885_s3 + $0xb0] sm:$0xff]  ;;  %v1903_v44 = vld [vmem:[%s2885_s3 + $0xa8] sm:$0xff]  ;;  %vm1223_vm12 = vcmask 254976   ;;  %vm1618_vm13 = vmmov 0   ;;  %vm1269_vm14 = vcmask 261120  }
  0x15   :  { %368 = vmatpush1.msra.mxu0 %v1763_v23  ;;  %v1457_v29 = vld [vmem:[%s2882_s0 + $0x1] ss:$2 sm:$0x7]  ;;  %v1917_v46 = vld [vmem:[%s2885_s3 + $0x98] sm:$0xff]  ;;  %v2219_v7 = vld [vmem:[%s2885_s3 + $0x310] sm:$0xff]  ;;  %s1619_s2 = smov [#allocation4]  }
  0x16   :  { %656 = vrot.lane.b32.xlu0 %v1452_v15, %s1609_s14  ;;  %369 = vmatprep.subr.mxu0 %v2897_v11  ;;  %v1826_v33 = vld [vmem:[%s2885_s3 + $0x20] sm:$0xff]  ;;  %2954 = vst [vmem:[#allocation7_spill] sm:$0xff] %v1917_v46  ;;  %v1957_v14 = vld [vmem:[%s2885_s3 + $0x158] sm:$0xff]  ;;  %v1965_v15 = vld [vmem:[%s2885_s3 + $0x150] sm:$0xff]  ;;  %s1351_s26 = sshll.u32 %s1619_s2, 4  ;;  %vm1343_vm15 = vcmask 58368   ;;  %s1352_s26 = int_to_ptr.vmem [resolvable:$true] %s1351_s26 }
  0x17   :  { %647 = vrot.lane.b32.xlu1 %v1451_v17, %s1610_s19  ;;  %370 = vmatpush1.msra.mxu0 %v1775_v25  ;;  %v1854_v37 = vld [vmem:[%s2885_s3] sm:$0xff]  ;;  %v1972_v17 = vld [vmem:[%s2885_s3 + $0x148] sm:$0xff]  ;;  %p1591_p1 = scmp.lt.s32.totalorder %s1352_s26, %s1352_s26 }
  0x18   :  { %371 = vmatprep.subr.mxu0 %v2897_v11  ;;  %v1882_v41 = vld [vmem:[%s2885_s3 + $0xc0] sm:$0xff] }
  0x19   :  { %372 = vmatpush1.msra.mxu0 %v1785_v27  ;;  %v1910_v45 = vld [vmem:[%s2885_s3 + $0xa0] sm:$0xff] }
  0x1a   :  { %674 = vrot.lane.b32.xlu0 %v1454_v20, %s1612_s27  ;;  %373 = vmatprep.subr.mxu0 %v2897_v11  ;;  %v1952_v13 = vld [vmem:[%s2883_s1] sm:$0xf] }
  0x1b   :  { %665 = vrot.lane.b32.xlu1 %v1453_v22, %s1611_s22  ;;  %374 = vmatpush1.msra.mxu0 %v1794_v28  ;;  %v1979_v20 = vld [vmem:[%s2885_s3 + $0x140] sm:$0xff]  ;;  %v1986_v22 = vld [vmem:[%s2885_s3 + $0x138] sm:$0xff] }
  0x1c   :  { %375 = vmatprep.subr.mxu0 %v2897_v11 }
  0x1d   :  { %376 = vmatpush1.msra.mxu0 %v1804_v30 }
  0x1e   :  { %692 = vrot.lane.b32.xlu0 %v1456_v24, %s1614_s13  ;;  %377 = vmatprep.subr.mxu0 %v2897_v11  ;;  %v1993_v24 = vld [vmem:[%s2885_s3 + $0x130] sm:$0xff] }
  0x1f   :  { %683 = vrot.lane.b32.xlu1 %v1455_v26, %s1613_s28  ;;  %378 = vmatpush1.msra.mxu0 %v1812_v31  ;;  %v2000_v26 = vld [vmem:[%s2885_s3 + $0x128] sm:$0xff] }
  0x20   :  { %379 = vmatprep.subr.mxu0 %v2897_v11 }
  0x21   :  { %380 = vmatpush1.msra.mxu0 %v1819_v32 }
  0x22   :  { %381 = vmatprep.subr.mxu0 %v2897_v11 }
  0x23   :  { %701 = vrot.lane.b32.xlu1 %v1457_v29, %s1616_s15  ;;  %382 = vmatpush1.msra.mxu0 %v1826_v33  ;;  %v2007_v29 = vld [vmem:[%s2885_s3 + $0x120] sm:$0xff] }
  0x24   :  { %383 = vmatprep.subr.mxu0 %v2897_v11 }
  0x25   :  { %384 = vmatpush1.msra.mxu0 %v1833_v34 }
  0x26   :  { %385 = vmatprep.subr.mxu0 %v2897_v11 }
  0x27   :  { %386 = vmatpush1.msra.mxu0 %v1840_v35 }
  0x28   :  { %387 = vmatprep.subr.mxu0 %v2897_v11 }
  0x29   :  { %388 = vmatpush1.msra.mxu0 %v1847_v36 }
  0x2a   :  { %389 = vmatprep.subr.mxu0 %v2897_v11 }
  0x2b   :  { %390 = vmatpush1.msra.mxu0 %v1854_v37 }
  0x2c   :  { %399 = vmatprep.subr.mxu0 %v2897_v11 }
  0x2d   :  { %400 = vmatpush2.msra.mxu0 %v1861_v38 }
  0x2e   :  { %401 = vmatprep.subr.mxu0 %v2897_v11 }
  0x2f   :  { %402 = vmatpush2.msra.mxu0 %v1868_v39 }
  0x30   :  { %403 = vmatprep.subr.mxu0 %v2897_v11 }
  0x31   :  { %404 = vmatpush2.msra.mxu0 %v1875_v40 }
  0x32   :  { %405 = vmatprep.subr.mxu0 %v2897_v11 }
  0x33   :  { %406 = vmatpush2.msra.mxu0 %v1882_v41 }
  0x34   :  { %407 = vmatprep.subr.mxu0 %v2897_v11 }
  0x35   :  { %408 = vmatpush2.msra.mxu0 %v1889_v42 }
  0x36   :  { %409 = vmatprep.subr.mxu0 %v2897_v11 }
  0x37   :  { %410 = vmatpush2.msra.mxu0 %v1896_v43 }
  0x38   :  { %411 = vmatprep.subr.mxu0 %v2897_v11 }
  0x39   :  { %412 = vmatpush2.msra.mxu0 %v1903_v44 }
  0x3a   :  { %413 = vmatprep.subr.mxu0 %v2897_v11 }
  0x3b   :  { %414 = vmatpush2.msra.mxu0 %v1910_v45 }
  0x3c   :  { %415 = vmatprep.subr.mxu0 %v2897_v11 }
  0x3d   :  { %416 = vmatpush2.msra.mxu0 %v1917_v46 }
  0x3e   :  { %417 = vmatprep.subr.mxu0 %v2897_v11 }
  0x74   :  { %v122_v47 = vpop.permute.xlu0 %121 }
  0x75   :  { %v123_v48 = vrot.slane %v122_v47, 1  ;;  %v56_v49 = vpop.permute.xlu1 %55 }
  0x76   :  { %v57_v50 = vrot.slane %v56_v49, 1 }
  0x77   :  { %v125_v51 = vsel %vm124_vm1, %v122_v47, %v123_v48  ;;  %v2014_v47 = vld [vmem:[%s2885_s3 + $0x118] sm:$0xff]  ;;  %v2021_v48 = vld [vmem:[%s2885_s3 + $0x110] sm:$0xff] }
  0x78   :  { %128 = vst.msk [vmem:[#allocation2 + $0x10] ss:$8 sm:$0x3] %vm1692_vm0, %v125_v51  ;;  %v59_v52 = vsel %vm58_vm2, %v56_v49, %v57_v50  ;;  %v45_v53 = vpop.permute.xlu0 %44  ;;  %v2028_v49 = vld [vmem:[%s2885_s3 + $0x108] sm:$0xff]  ;;  %v2035_v50 = vld [vmem:[%s2885_s3 + $0x100] sm:$0xff]  ;;  %v2042_v51 = vld [vmem:[%s2885_s3 + $0xf8] sm:$0xff] }
  0x79   :  { %62 = vst.msk [vmem:[#allocation2 + $0x2] ss:$8 sm:$0x3] %vm1692_vm0, %v59_v52  ;;  %v67_v54 = vpop.permute.xlu1 %66  ;;  %v46_v55 = vrot.slane %v45_v53, 1  ;;  %v2049_v52 = vld [vmem:[%s2885_s3 + $0xf0] sm:$0xff] }
  0x7a   :  { %v68_v56 = vrot.slane %v67_v54, 1 }
  0x7b   :  { %v48_v57 = vsel %vm47_vm3, %v45_v53, %v46_v55  ;;  %v2056_v53 = vld [vmem:[%s2885_s3 + $0xe8] sm:$0xff]  ;;  %v2070_v55 = vld [vmem:[%s2885_s3 + $0x1b8] sm:$0xff] }
  0x7c   :  { %v70_v58 = vsel %vm69_vm4, %v67_v54, %v68_v56  ;;  %51 = vst.msk [vmem:[#allocation2 + $0x1] ss:$8 sm:$0x3] %vm1692_vm0, %v48_v57  ;;  %v78_v59 = vpop.permute.xlu0 %77  ;;  %v2063_v54 = vld [vmem:[%s2885_s3 + $0xe0] sm:$0xff]  ;;  %v2077_v56 = vld [vmem:[%s2885_s3 + $0x1b0] sm:$0xff]  ;;  %v2084_v57 = vld [vmem:[%s2885_s3 + $0x1a8] sm:$0xff] }
  0x7d   :  { %73 = vst.msk [vmem:[#allocation2 + $0x3] ss:$8 sm:$0x3] %vm1692_vm0, %v70_v58  ;;  %v89_v60 = vpop.permute.xlu1 %88  ;;  %v79_v61 = vrot.slane %v78_v59, 1  ;;  %v2091_v58 = vld [vmem:[%s2885_s3 + $0x1a0] sm:$0xff] }
  0x7e   :  { %v90_v62 = vrot.slane %v89_v60, 1 }
  0x7f   :  { %v81_v63 = vsel %vm80_vm5, %v78_v59, %v79_v61  ;;  %v133_v0 = vld [vmem:[#allocation2 + $0x18] sm:$0x1]  ;;  %v132_v1 = vld [vmem:[#allocation2 + $0x10] sm:$0x1]  ;;  %v2112_v61 = vld [vmem:[%s2885_s3 + $0x188] sm:$0xff] }
  0x80   :  { %v92_v2 = vsel %vm91_vm6, %v89_v60, %v90_v62  ;;  %84 = vst.msk [vmem:[#allocation2 + $0x4] ss:$8 sm:$0x3] %vm1692_vm0, %v81_v63  ;;  %v100_v3 = vpop.permute.xlu0 %99  ;;  %1359 = vmatprep.subr.msk.mxu1 %vm143_vm7, %v133_v0  ;;  %v2098_v59 = vld [vmem:[%s2885_s3 + $0x198] sm:$0xff]  ;;  %v2105_v60 = vld [vmem:[%s2885_s3 + $0x190] sm:$0xff]  ;;  %v2121_v62 = vld [vmem:[%s2885_s3 + $0x180] sm:$0xff] }
  0x81   :  { %95 = vst.msk [vmem:[#allocation2 + $0x5] ss:$8 sm:$0x3] %vm1692_vm0, %v92_v2  ;;  %v111_v4 = vpop.permute.xlu1 %110  ;;  %v101_v5 = vrot.slane %v100_v3, 1  ;;  %1360 = vmatpush1.msk.msra.mxu1 %vm143_vm7, %v132_v1  ;;  %v2128_v63 = vld [vmem:[%s2885_s3 + $0x178] sm:$0xff]  ;;  %v2133_v0 = vld [vmem:[%s2885_s3 + $0x90] sm:$0xff] }
  0x82   :  { %v112_v6 = vrot.slane %v111_v4, 1  ;;  %2955 = vst [vmem:[#allocation8_spill] sm:$0xff] %v2133_v0  ;;  %418 = vmatpush2.msra.mxu0 %v2133_v0  ;;  %v2142_v1 = vld [vmem:[%s2885_s3 + $0x170] sm:$0xff]  ;;  %v2147_v2 = vld [vmem:[%s2885_s3 + $0x88] sm:$0xff] }
  0x83   :  { %v103_v8 = vsel %vm102_vm8, %v100_v3, %v101_v5  ;;  %419 = vmatprep.subr.mxu0 %v2897_v11  ;;  %2956 = vst [vmem:[#allocation9_spill] sm:$0xff] %v2142_v1  ;;  %2957 = vst [vmem:[#allocation10_spill] sm:$0xff] %v2147_v2  ;;  %v2156_v3 = vld [vmem:[%s2885_s3 + $0x168] sm:$0xff]  ;;  %v2170_v5 = vld [vmem:[%s2885_s3 + $0x160] sm:$0xff] }
  0x84   :  { %v114_v9 = vsel %vm113_vm9, %v111_v4, %v112_v6  ;;  %106 = vst.msk [vmem:[#allocation2 + $0x6] ss:$8 sm:$0x3] %vm1692_vm0, %v103_v8  ;;  %420 = vmatpush2.msra.mxu0 %v2147_v2  ;;  %2958 = vst [vmem:[#allocation11_spill] sm:$0xff] %v2156_v3  ;;  %v2161_v4 = vld [vmem:[%s2885_s3 + $0x80] sm:$0xff] }
  0x85   :  { %117 = vst.msk [vmem:[#allocation2 + $0x7] ss:$8 sm:$0x3] %vm1692_vm0, %v114_v9  ;;  %421 = vmatprep.subr.mxu0 %v2897_v11  ;;  %2959 = vst [vmem:[#allocation12_spill] sm:$0xff] %v2161_v4  ;;  %v711_v6 = vpop.permute.xlu1 %710 }
  0x86   :  { %422 = vmatpush2.msra.mxu0 %v2161_v4  ;;  %2960 = vst [vmem:[#allocation13_spill] sm:$0xff] %v2170_v5  ;;  %v712_v8 = vrot.slane %v711_v6, 1 }
  0x87   :  { %568 = vmatprep.subr.mxu0 %v2897_v11 }
  0x88   :  { %v713_v9 = vsel %vm124_vm1, %v711_v6, %v712_v8 }
  0x89   :  { %715 = vst.msk [vmem:[#allocation2 + $0x10] ss:$8 sm:$0x3] %vm1692_vm0, %v713_v9 }
  0x8c   :  { %v131_v10 = vld [vmem:[#allocation2 + $0x8] sm:$0xff]  ;;  %v130_v12 = vld [vmem:[#allocation2] sm:$0xff] }
  0x8d   :  { %180 = vmatprep.subr.mxu1 %v131_v10  ;;  %v2175_v10 = vpop.permute.xlu0 %136 }
  0x8e   :  { %181 = vmatpush1.msra.mxu1 %v130_v12  ;;  %v648_v12 = vpop.permute.xlu1 %647 }
  0x8f   :  { %1361 = vmatmul.mubr.msk.f32.vlgmr.msra.gmra.mxu1 %vm139_vm10, %v1952_v13  ;;  %287 = vmatprep.subr.mxu1 %v2897_v11  ;;  %v649_v4 = vrot.slane %v648_v12, 1 }
  0x90   :  { %288 = vmatpush1.msra.mxu1 %v1957_v14 }
  0x91   :  { %289 = vmatprep.subr.mxu1 %v2897_v11  ;;  %v650_v2 = vsel %vm47_vm3, %v648_v12, %v649_v4 }
  0x92   :  { %290 = vmatpush1.msra.mxu1 %v1965_v15  ;;  %652 = vst.msk [vmem:[#allocation2 + $0x1] ss:$8 sm:$0x3] %vm1692_vm0, %v650_v2 }
  0x93   :  { %291 = vmatprep.subr.mxu1 %v2897_v11 }
  0x94   :  { %292 = vmatpush1.msra.mxu1 %v1972_v17 }
  0x95   :  { %293 = vmatprep.subr.mxu1 %v2897_v11 }
  0x96   :  { %294 = vmatpush1.msra.mxu1 %v1979_v20 }
  0x97   :  { %295 = vmatprep.subr.mxu1 %v2897_v11 }
  0x98   :  { %296 = vmatpush1.msra.mxu1 %v1986_v22 }
  0x99   :  { %297 = vmatprep.subr.mxu1 %v2897_v11 }
  0x9a   :  { %298 = vmatpush1.msra.mxu1 %v1993_v24 }
  0x9b   :  { %299 = vmatprep.subr.mxu1 %v2897_v11 }
  0x9c   :  { %300 = vmatpush1.msra.mxu1 %v2000_v26 }
  0x9d   :  { %301 = vmatprep.subr.mxu1 %v2897_v11 }
  0x9e   :  { %302 = vmatpush1.msra.mxu1 %v2007_v29 }
  0x9f   :  { %303 = vmatprep.subr.mxu1 %v2897_v11 }
  0xa0   :  { %304 = vmatpush1.msra.mxu1 %v2014_v47 }
  0xa1   :  { %305 = vmatprep.subr.mxu1 %v2897_v11 }
  0xa2   :  { %306 = vmatpush1.msra.mxu1 %v2021_v48 }
  0xa3   :  { %307 = vmatprep.subr.mxu1 %v2897_v11 }
  0xa4   :  { %308 = vmatpush1.msra.mxu1 %v2028_v49 }
  0xa5   :  { %309 = vmatprep.subr.mxu1 %v2897_v11 }
  0xa6   :  { %310 = vmatpush1.msra.mxu1 %v2035_v50 }
  0xa7   :  { %311 = vmatprep.subr.mxu1 %v2897_v11 }
  0xa8   :  { %312 = vmatpush1.msra.mxu1 %v2042_v51 }
  0xa9   :  { %313 = vmatprep.subr.mxu1 %v2897_v11 }
  0xaa   :  { %314 = vmatpush1.msra.mxu1 %v2049_v52 }
  0xab   :  { %315 = vmatprep.subr.mxu1 %v2897_v11 }
  0xac   :  { %316 = vmatpush1.msra.mxu1 %v2056_v53 }
  0xad   :  { %317 = vmatprep.subr.mxu1 %v2897_v11 }
  0xae   :  { %318 = vmatpush1.msra.mxu1 %v2063_v54 }
  0xaf   :  { %327 = vmatprep.subr.mxu1 %v2897_v11 }
  0xb0   :  { %328 = vmatpush2.msra.mxu1 %v2070_v55 }
  0xb1   :  { %329 = vmatprep.subr.mxu1 %v2897_v11 }
  0xb2   :  { %330 = vmatpush2.msra.mxu1 %v2077_v56 }
  0xb3   :  { %331 = vmatprep.subr.mxu1 %v2897_v11 }
  0xb4   :  { %332 = vmatpush2.msra.mxu1 %v2084_v57 }
  0xb5   :  { %333 = vmatprep.subr.mxu1 %v2897_v11 }
  0xb6   :  { %334 = vmatpush2.msra.mxu1 %v2091_v58 }
  0xb7   :  { %335 = vmatprep.subr.mxu1 %v2897_v11 }
  0xb8   :  { %336 = vmatpush2.msra.mxu1 %v2098_v59 }
  0xb9   :  { %337 = vmatprep.subr.mxu1 %v2897_v11 }
  0xba   :  { %338 = vmatpush2.msra.mxu1 %v2105_v60 }
  0xbb   :  { %339 = vmatprep.subr.mxu1 %v2897_v11 }
  0xbc   :  { %340 = vmatpush2.msra.mxu1 %v2112_v61 }
  0xbd   :  { %341 = vmatprep.subr.mxu1 %v2897_v11 }
  0xbe   :  { %342 = vmatpush2.msra.mxu1 %v2121_v62 }
  0xbf   :  { %343 = vmatprep.subr.mxu1 %v2897_v11 }
  0xc0   :  { %344 = vmatpush2.msra.mxu1 %v2128_v63 }
  0xc1   :  { %345 = vmatprep.subr.mxu1 %v2897_v11 }
  0xc2   :  { %346 = vmatpush2.msra.mxu1 %v2142_v1 }
  0xc3   :  { %347 = vmatprep.subr.mxu1 %v2897_v11 }
  0xc4   :  { %348 = vmatpush2.msra.mxu1 %v2156_v3  ;;  %v666_v3 = vpop.permute.xlu1 %665 }
  0xc5   :  { %349 = vmatprep.subr.mxu1 %v2897_v11  ;;  %v667_v0 = vrot.slane %v666_v3, 1 }
  0xc6   :  { %350 = vmatpush2.msra.mxu1 %v2170_v5  ;;  %v657_v5 = vpop.permute.xlu0 %656 }
  0xc7   :  { %463 = vmatprep.subr.mxu1 %v2897_v11  ;;  %v658_v11 = vrot.slane %v657_v5, 1  ;;  %v668_v1 = vsel %vm69_vm4, %v666_v3, %v667_v0 }
  0xc8   :  { %670 = vst.msk [vmem:[#allocation2 + $0x3] ss:$8 sm:$0x3] %vm1692_vm0, %v668_v1  ;;  %v684_v8 = vpop.permute.xlu1 %683 }
  0xc9   :  { %v659_v6 = vsel %vm58_vm2, %v657_v5, %v658_v11  ;;  %v685_v4 = vrot.slane %v684_v8, 1 }
  0xca   :  { %661 = vst.msk [vmem:[#allocation2 + $0x2] ss:$8 sm:$0x3] %vm1692_vm0, %v659_v6  ;;  %v675_v9 = vpop.permute.xlu0 %674 }
  0xcb   :  { %v676_v12 = vrot.slane %v675_v9, 1  ;;  %v686_v2 = vsel %vm91_vm6, %v684_v8, %v685_v4  ;;  %v1450_v8 = vld [vmem:[%s2882_s0 + $0x1] ss:$2 sm:$0x3] }
  0xcc   :  { %688 = vst.msk [vmem:[#allocation2 + $0x5] ss:$8 sm:$0x3] %vm1692_vm0, %v686_v2  ;;  %v702_v11 = vpop.permute.xlu1 %701  ;;  %643 = vst.msk [vmem:[#allocation2] ss:$8 sm:$0x3] %vm1692_vm0, %v1450_v8 }
  0xcd   :  { %v677_v46 = vsel %vm80_vm5, %v675_v9, %v676_v12  ;;  %v703_v1 = vrot.slane %v702_v11, 1  ;;  %v2961_v8 = vmov 0.0  }
  0xce   :  { %679 = vst.msk [vmem:[#allocation2 + $0x4] ss:$8 sm:$0x3] %vm1692_vm0, %v677_v46  ;;  %v693_v0 = vpop.permute.xlu0 %692 }
  0xcf   :  { %v694_v3 = vrot.slane %v693_v0, 1  ;;  %v704_v5 = vsel %vm113_vm9, %v702_v11, %v703_v1 }
  0xd0   :  { %706 = vst.msk [vmem:[#allocation2 + $0x7] ss:$8 sm:$0x3] %vm1692_vm0, %v704_v5 }
  0xd1   :  { %v695_v6 = vsel %vm102_vm8, %v693_v0, %v694_v3  ;;  %v2212_v0 = vld [vmem:[%s2885_s3 + $0x318] sm:$0xff] }
  0xd2   :  { %697 = vst.msk [vmem:[#allocation2 + $0x6] ss:$8 sm:$0x3] %vm1692_vm0, %v695_v6  ;;  %v2227_v6 = vld [vmem:[%s2885_s3 + $0x238] sm:$0xff] }
 0x14f   :  { %v216_v46 = vpop.f32.mrf.mxu1 }
 0x150   :  { %v217_v9 = vadd.f32 %v216_v46, %v2175_v10 }
 0x151   :  { %v218_v4 = vpop.f32.mrf.mxu1 }
 0x152   :  { %v219_v12 = vadd.f32 %v218_v4, %v2175_v10  ;;  %v2207_v2 = vmax.f32 %v217_v9, 0.0  ;;  %v2235_v9 = vld [vmem:[%s2885_s3 + $0x230] sm:$0xff]  ;;  %v2240_v4 = vld [vmem:[%s2885_s3 + $0x308] sm:$0xff] }
 0x153   :  { %2962 = vst [vmem:[#allocation14_spill] sm:$0xff] %v2235_v9  ;;  %2963 = vst [vmem:[#allocation15_spill] sm:$0xff] %v2240_v4 }
 0x154   :  { %v222_v11 = vmax.f32 %v219_v12, 0.0  ;;  %v282_v5 = vrot.slane %v2207_v2, 1  ;;  %v2249_v12 = vld [vmem:[%s2885_s3 + $0x228] sm:$0xff] }
 0x155   :  { %2964 = vst [vmem:[#allocation16_spill] sm:$0xff] %v2249_v12 }
 0x156   :  { %1391 = vmatprep.mubr.msk.f32.mxu0 %vm102_vm8, %v222_v11  ;;  %v283_v1 = vrot.slane %v222_v11, 1  ;;  %v564_v3 = vrot.slane %v222_v11, 3  ;;  %v459_v46 = vrot.slane %v222_v11, 2  ;;  %v2254_v11 = vld [vmem:[%s2885_s3 + $0x300] sm:$0xff] }
 0x157   :  { %424 = vmatmul.mubr.f32.vlgmr.msra.gmra.mxu0 %v2207_v2  ;;  %2965 = vst [vmem:[#allocation17_spill] sm:$0xff] %v2254_v11 }
 0x158   :  { %569 = vmatpush1.msra.mxu0 %v2212_v0  ;;  %1390 = vmatprep.mubr.msk.f32.mxu1 %vm102_vm8, %v283_v1  ;;  %v2263_v1 = vld [vmem:[%s2885_s3 + $0x220] sm:$0xff] }
 0x159   :  { %570 = vmatprep.subr.mxu0 %v2961_v8  ;;  %1449 = vmatprep.mubr.msk.f32.mxu0 %vm102_vm8, %v564_v3  ;;  %2966 = vst [vmem:[#allocation18_spill] sm:$0xff] %v2263_v1  ;;  %v2268_v3 = vld [vmem:[%s2885_s3 + $0x2f8] sm:$0xff] }
 0x15a   :  { %352 = vmatmul.mubr.f32.vlgmr.msra.gmra.mxu1 %v282_v5  ;;  %571 = vmatpush1.msra.mxu0 %v2219_v7  ;;  %2967 = vst [vmem:[#allocation19_spill] sm:$0xff] %v2268_v3  ;;  %v2277_v5 = vld [vmem:[%s2885_s3 + $0x218] sm:$0xff] }
 0x15b   :  { %464 = vmatpush1.msra.mxu1 %v2227_v6  ;;  %1420 = vmatprep.mubr.msk.f32.mxu1 %vm102_vm8, %v459_v46  ;;  %2968 = vst [vmem:[#allocation20_spill] sm:$0xff] %v2277_v5  ;;  %v2282_v46 = vld [vmem:[%s2885_s3 + $0x2f0] sm:$0xff] }
 0x15c   :  { %465 = vmatprep.subr.mxu1 %v2961_v8  ;;  %572 = vmatprep.subr.mxu0 %v2961_v8  ;;  %2969 = vst [vmem:[#allocation21_spill] sm:$0xff] %v2282_v46 }
 0x15d   :  { %466 = vmatpush1.msra.mxu1 %v2235_v9  ;;  %573 = vmatpush1.msra.mxu0 %v2240_v4  ;;  %v719_v4 = vld [vmem:[#allocation2 + $0x10] sm:$0x1]  ;;  %v718_v9 = vld [vmem:[#allocation2 + $0x8] sm:$0xff] }
 0x15e   :  { %467 = vmatprep.subr.mxu1 %v2961_v8  ;;  %574 = vmatprep.subr.mxu0 %v2961_v8 }
 0x15f   :  { %468 = vmatpush1.msra.mxu1 %v2249_v12  ;;  %575 = vmatpush1.msra.mxu0 %v2254_v11  ;;  %v2291_v11 = vld [vmem:[%s2885_s3 + $0x210] sm:$0xff]  ;;  %v2296_v12 = vld [vmem:[%s2885_s3 + $0x2e8] sm:$0xff] }
 0x160   :  { %469 = vmatprep.subr.mxu1 %v2961_v8  ;;  %576 = vmatprep.subr.mxu0 %v2961_v8  ;;  %2970 = vst [vmem:[#allocation22_spill] sm:$0xff] %v2291_v11  ;;  %2971 = vst [vmem:[#allocation23_spill] sm:$0xff] %v2296_v12 }
 0x161   :  { %470 = vmatpush1.msra.mxu1 %v2263_v1  ;;  %577 = vmatpush1.msra.mxu0 %v2268_v3  ;;  %v2305_v3 = vld [vmem:[%s2885_s3 + $0x208] sm:$0xff]  ;;  %v2310_v1 = vld [vmem:[%s2885_s3 + $0x2e0] sm:$0xff] }
 0x162   :  { %471 = vmatprep.subr.mxu1 %v2961_v8  ;;  %578 = vmatprep.subr.mxu0 %v2961_v8  ;;  %2972 = vst [vmem:[#allocation24_spill] sm:$0xff] %v2305_v3  ;;  %2973 = vst [vmem:[#allocation25_spill] sm:$0xff] %v2310_v1 }
 0x163   :  { %472 = vmatpush1.msra.mxu1 %v2277_v5  ;;  %579 = vmatpush1.msra.mxu0 %v2282_v46  ;;  %v2319_v46 = vld [vmem:[%s2885_s3 + $0x200] sm:$0xff]  ;;  %v2324_v5 = vld [vmem:[%s2885_s3 + $0x2d8] sm:$0xff] }
 0x164   :  { %473 = vmatprep.subr.mxu1 %v2961_v8  ;;  %580 = vmatprep.subr.mxu0 %v2961_v8  ;;  %2974 = vst [vmem:[#allocation26_spill] sm:$0xff] %v2319_v46  ;;  %2975 = vst [vmem:[#allocation27_spill] sm:$0xff] %v2324_v5 }
 0x165   :  { %474 = vmatpush1.msra.mxu1 %v2291_v11  ;;  %581 = vmatpush1.msra.mxu0 %v2296_v12  ;;  %v2333_v12 = vld [vmem:[%s2885_s3 + $0x1f8] sm:$0xff]  ;;  %v2338_v11 = vld [vmem:[%s2885_s3 + $0x2d0] sm:$0xff] }
 0x166   :  { %475 = vmatprep.subr.mxu1 %v2961_v8  ;;  %582 = vmatprep.subr.mxu0 %v2961_v8  ;;  %2976 = vst [vmem:[#allocation28_spill] sm:$0xff] %v2333_v12  ;;  %2977 = vst [vmem:[#allocation29_spill] sm:$0xff] %v2338_v11 }
 0x167   :  { %476 = vmatpush1.msra.mxu1 %v2305_v3  ;;  %583 = vmatpush1.msra.mxu0 %v2310_v1  ;;  %v2347_v1 = vld [vmem:[%s2885_s3 + $0x1f0] sm:$0xff]  ;;  %v2352_v3 = vld [vmem:[%s2885_s3 + $0x2c8] sm:$0xff] }
 0x168   :  { %477 = vmatprep.subr.mxu1 %v2961_v8  ;;  %584 = vmatprep.subr.mxu0 %v2961_v8  ;;  %2978 = vst [vmem:[#allocation30_spill] sm:$0xff] %v2347_v1  ;;  %2979 = vst [vmem:[#allocation31_spill] sm:$0xff] %v2352_v3 }
 0x169   :  { %478 = vmatpush1.msra.mxu1 %v2319_v46  ;;  %585 = vmatpush1.msra.mxu0 %v2324_v5  ;;  %v2361_v5 = vld [vmem:[%s2885_s3 + $0x1e8] sm:$0xff]  ;;  %v2366_v46 = vld [vmem:[%s2885_s3 + $0x2c0] sm:$0xff] }
 0x16a   :  { %479 = vmatprep.subr.mxu1 %v2961_v8  ;;  %586 = vmatprep.subr.mxu0 %v2961_v8  ;;  %2980 = vst [vmem:[#allocation32_spill] sm:$0xff] %v2361_v5  ;;  %2981 = vst [vmem:[#allocation33_spill] sm:$0xff] %v2366_v46 }
 0x16b   :  { %480 = vmatpush1.msra.mxu1 %v2333_v12  ;;  %587 = vmatpush1.msra.mxu0 %v2338_v11  ;;  %v2375_v11 = vld [vmem:[%s2885_s3 + $0x1e0] sm:$0xff]  ;;  %v2380_v12 = vld [vmem:[%s2885_s3 + $0x2b8] sm:$0xff] }
 0x16c   :  { %481 = vmatprep.subr.mxu1 %v2961_v8  ;;  %588 = vmatprep.subr.mxu0 %v2961_v8  ;;  %2982 = vst [vmem:[#allocation34_spill] sm:$0xff] %v2375_v11  ;;  %2983 = vst [vmem:[#allocation35_spill] sm:$0xff] %v2380_v12 }
 0x16d   :  { %482 = vmatpush1.msra.mxu1 %v2347_v1  ;;  %589 = vmatpush1.msra.mxu0 %v2352_v3  ;;  %v2389_v3 = vld [vmem:[%s2885_s3 + $0x1d8] sm:$0xff]  ;;  %v2394_v1 = vld [vmem:[%s2885_s3 + $0x2b0] sm:$0xff] }
 0x16e   :  { %483 = vmatprep.subr.mxu1 %v2961_v8  ;;  %590 = vmatprep.subr.mxu0 %v2961_v8  ;;  %2984 = vst [vmem:[#allocation36_spill] sm:$0xff] %v2389_v3  ;;  %2985 = vst [vmem:[#allocation37_spill] sm:$0xff] %v2394_v1 }
 0x16f   :  { %484 = vmatpush1.msra.mxu1 %v2361_v5  ;;  %591 = vmatpush1.msra.mxu0 %v2366_v46  ;;  %v2403_v46 = vld [vmem:[%s2885_s3 + $0x1d0] sm:$0xff]  ;;  %v2408_v5 = vld [vmem:[%s2885_s3 + $0x2a8] sm:$0xff] }
 0x170   :  { %485 = vmatprep.subr.mxu1 %v2961_v8  ;;  %592 = vmatprep.subr.mxu0 %v2961_v8  ;;  %2986 = vst [vmem:[#allocation38_spill] sm:$0xff] %v2403_v46  ;;  %2987 = vst [vmem:[#allocation39_spill] sm:$0xff] %v2408_v5 }
 0x171   :  { %486 = vmatpush1.msra.mxu1 %v2375_v11  ;;  %593 = vmatpush1.msra.mxu0 %v2380_v12  ;;  %v2417_v12 = vld [vmem:[%s2885_s3 + $0x1c8] sm:$0xff]  ;;  %v2422_v11 = vld [vmem:[%s2885_s3 + $0x2a0] sm:$0xff] }
 0x172   :  { %487 = vmatprep.subr.mxu1 %v2961_v8  ;;  %594 = vmatprep.subr.mxu0 %v2961_v8  ;;  %2988 = vst [vmem:[#allocation40_spill] sm:$0xff] %v2417_v12  ;;  %2989 = vst [vmem:[#allocation41_spill] sm:$0xff] %v2422_v11 }
 0x173   :  { %488 = vmatpush1.msra.mxu1 %v2389_v3  ;;  %595 = vmatpush1.msra.mxu0 %v2394_v1  ;;  %v2431_v1 = vld [vmem:[%s2885_s3 + $0x1c0] sm:$0xff]  ;;  %v2436_v3 = vld [vmem:[%s2885_s3 + $0x378] sm:$0xff] }
 0x174   :  { %489 = vmatprep.subr.mxu1 %v2961_v8  ;;  %596 = vmatprep.subr.mxu0 %v2961_v8  ;;  %2990 = vst [vmem:[#allocation42_spill] sm:$0xff] %v2431_v1  ;;  %2991 = vst [vmem:[#allocation43_spill] sm:$0xff] %v2436_v3 }
 0x175   :  { %490 = vmatpush1.msra.mxu1 %v2403_v46  ;;  %597 = vmatpush1.msra.mxu0 %v2408_v5  ;;  %v2445_v5 = vld [vmem:[%s2885_s3 + $0x298] sm:$0xff]  ;;  %v2450_v46 = vld [vmem:[%s2885_s3 + $0x370] sm:$0xff] }
 0x176   :  { %491 = vmatprep.subr.mxu1 %v2961_v8  ;;  %598 = vmatprep.subr.mxu0 %v2961_v8  ;;  %2992 = vst [vmem:[#allocation44_spill] sm:$0xff] %v2445_v5  ;;  %2993 = vst [vmem:[#allocation45_spill] sm:$0xff] %v2450_v46 }
 0x177   :  { %492 = vmatpush1.msra.mxu1 %v2417_v12  ;;  %599 = vmatpush1.msra.mxu0 %v2422_v11  ;;  %v2459_v11 = vld [vmem:[%s2885_s3 + $0x290] sm:$0xff]  ;;  %v2464_v12 = vld [vmem:[%s2885_s3 + $0x368] sm:$0xff] }
 0x178   :  { %493 = vmatprep.subr.mxu1 %v2961_v8  ;;  %608 = vmatprep.subr.mxu0 %v2961_v8  ;;  %2994 = vst [vmem:[#allocation46_spill] sm:$0xff] %v2459_v11  ;;  %2995 = vst [vmem:[#allocation47_spill] sm:$0xff] %v2464_v12 }
 0x179   :  { %494 = vmatpush1.msra.mxu1 %v2431_v1  ;;  %609 = vmatpush2.msra.mxu0 %v2436_v3  ;;  %v2473_v3 = vld [vmem:[%s2885_s3 + $0x288] sm:$0xff]  ;;  %v2478_v1 = vld [vmem:[%s2885_s3 + $0x360] sm:$0xff] }
 0x17a   :  { %503 = vmatprep.subr.mxu1 %v2961_v8  ;;  %610 = vmatprep.subr.mxu0 %v2961_v8  ;;  %2996 = vst [vmem:[#allocation48_spill] sm:$0xff] %v2473_v3  ;;  %2997 = vst [vmem:[#allocation49_spill] sm:$0xff] %v2478_v1 }
 0x17b   :  { %504 = vmatpush2.msra.mxu1 %v2445_v5  ;;  %611 = vmatpush2.msra.mxu0 %v2450_v46  ;;  %v2487_v46 = vld [vmem:[%s2885_s3 + $0x280] sm:$0xff]  ;;  %v2492_v5 = vld [vmem:[%s2885_s3 + $0x358] sm:$0xff] }
 0x17c   :  { %505 = vmatprep.subr.mxu1 %v2961_v8  ;;  %612 = vmatprep.subr.mxu0 %v2961_v8  ;;  %2998 = vst [vmem:[#allocation50_spill] sm:$0xff] %v2487_v46  ;;  %2999 = vst [vmem:[#allocation51_spill] sm:$0xff] %v2492_v5 }
 0x17d   :  { %506 = vmatpush2.msra.mxu1 %v2459_v11  ;;  %613 = vmatpush2.msra.mxu0 %v2464_v12  ;;  %v2501_v12 = vld [vmem:[%s2885_s3 + $0x278] sm:$0xff]  ;;  %v2506_v11 = vld [vmem:[%s2885_s3 + $0x350] sm:$0xff] }
 0x17e   :  { %507 = vmatprep.subr.mxu1 %v2961_v8  ;;  %614 = vmatprep.subr.mxu0 %v2961_v8  ;;  %3000 = vst [vmem:[#allocation52_spill] sm:$0xff] %v2501_v12  ;;  %3001 = vst [vmem:[#allocation53_spill] sm:$0xff] %v2506_v11 }
 0x17f   :  { %508 = vmatpush2.msra.mxu1 %v2473_v3  ;;  %615 = vmatpush2.msra.mxu0 %v2478_v1  ;;  %v2515_v1 = vld [vmem:[%s2885_s3 + $0x270] sm:$0xff]  ;;  %v2520_v3 = vld [vmem:[%s2885_s3 + $0x348] sm:$0xff] }
 0x180   :  { %509 = vmatprep.subr.mxu1 %v2961_v8  ;;  %616 = vmatprep.subr.mxu0 %v2961_v8  ;;  %3002 = vst [vmem:[#allocation54_spill] sm:$0xff] %v2515_v1  ;;  %3003 = vst [vmem:[#allocation55_spill] sm:$0xff] %v2520_v3 }
 0x181   :  { %510 = vmatpush2.msra.mxu1 %v2487_v46  ;;  %617 = vmatpush2.msra.mxu0 %v2492_v5  ;;  %v2529_v5 = vld [vmem:[%s2885_s3 + $0x268] sm:$0xff]  ;;  %v2534_v46 = vld [vmem:[%s2885_s3 + $0x340] sm:$0xff] }
 0x182   :  { %511 = vmatprep.subr.mxu1 %v2961_v8  ;;  %618 = vmatprep.subr.mxu0 %v2961_v8  ;;  %3004 = vst [vmem:[#allocation56_spill] sm:$0xff] %v2529_v5  ;;  %3005 = vst [vmem:[#allocation57_spill] sm:$0xff] %v2534_v46 }
 0x183   :  { %512 = vmatpush2.msra.mxu1 %v2501_v12  ;;  %619 = vmatpush2.msra.mxu0 %v2506_v11  ;;  %v2543_v11 = vld [vmem:[%s2885_s3 + $0x260] sm:$0xff]  ;;  %v2548_v12 = vld [vmem:[%s2885_s3 + $0x338] sm:$0xff] }
 0x184   :  { %513 = vmatprep.subr.mxu1 %v2961_v8  ;;  %620 = vmatprep.subr.mxu0 %v2961_v8  ;;  %3006 = vst [vmem:[#allocation58_spill] sm:$0xff] %v2543_v11  ;;  %3007 = vst [vmem:[#allocation59_spill] sm:$0xff] %v2548_v12 }
 0x185   :  { %514 = vmatpush2.msra.mxu1 %v2515_v1  ;;  %621 = vmatpush2.msra.mxu0 %v2520_v3  ;;  %v2557_v3 = vld [vmem:[%s2885_s3 + $0x258] sm:$0xff]  ;;  %v2562_v1 = vld [vmem:[%s2885_s3 + $0x330] sm:$0xff] }
 0x186   :  { %515 = vmatprep.subr.mxu1 %v2961_v8  ;;  %622 = vmatprep.subr.mxu0 %v2961_v8  ;;  %3008 = vst [vmem:[#allocation60_spill] sm:$0xff] %v2557_v3  ;;  %3009 = vst [vmem:[#allocation61_spill] sm:$0xff] %v2562_v1 }
 0x187   :  { %516 = vmatpush2.msra.mxu1 %v2529_v5  ;;  %623 = vmatpush2.msra.mxu0 %v2534_v46  ;;  %v2571_v46 = vld [vmem:[%s2885_s3 + $0x250] sm:$0xff]  ;;  %v2576_v5 = vld [vmem:[%s2885_s3 + $0x328] sm:$0xff] }
 0x188   :  { %517 = vmatprep.subr.mxu1 %v2961_v8  ;;  %624 = vmatprep.subr.mxu0 %v2961_v8  ;;  %3010 = vst [vmem:[#allocation62_spill] sm:$0xff] %v2571_v46  ;;  %3011 = vst [vmem:[#allocation63_spill] sm:$0xff] %v2576_v5 }
 0x189   :  { %518 = vmatpush2.msra.mxu1 %v2543_v11  ;;  %625 = vmatpush2.msra.mxu0 %v2548_v12  ;;  %v2585_v12 = vld [vmem:[%s2885_s3 + $0x248] sm:$0xff]  ;;  %v2590_v11 = vld [vmem:[%s2885_s3 + $0x320] sm:$0xff] }
 0x18a   :  { %519 = vmatprep.subr.mxu1 %v2961_v8  ;;  %626 = vmatprep.subr.mxu0 %v2961_v8  ;;  %3012 = vst [vmem:[#allocation64_spill] sm:$0xff] %v2590_v11 }
 0x18b   :  { %520 = vmatpush2.msra.mxu1 %v2557_v3  ;;  %627 = vmatpush2.msra.mxu0 %v2562_v1  ;;  %v563_v1 = vrot.slane %v2207_v2, 3  ;;  %v2600_v3 = vld [vmem:[%s2885_s3 + $0x240] sm:$0xff] }
 0x18c   :  { %521 = vmatprep.subr.mxu1 %v2961_v8  ;;  %628 = vmatprep.subr.mxu0 %v2961_v8 }
 0x18d   :  { %522 = vmatpush2.msra.mxu1 %v2571_v46  ;;  %629 = vmatpush2.msra.mxu0 %v2576_v5  ;;  %v458_v5 = vrot.slane %v2207_v2, 2  ;;  %v720_v46 = vld [vmem:[#allocation2 + $0x18] sm:$0x1] }
 0x18e   :  { %523 = vmatprep.subr.mxu1 %v2961_v8  ;;  %630 = vmatprep.subr.mxu0 %v2961_v8  ;;  %v3043_v2 = vld [vmem:[#allocation37_spill] sm:$0xff] }
 0x18f   :  { %524 = vmatpush2.msra.mxu1 %v2585_v12  ;;  %631 = vmatpush2.msra.mxu0 %v2590_v11  ;;  %v717_v11 = vld [vmem:[#allocation2] sm:$0xff] }
 0x190   :  { %525 = vmatprep.subr.mxu1 %v2961_v8  ;;  %633 = vmatmul.mubr.f32.vlgmr.msra.gmra.mxu0 %v563_v1  ;;  %v3050_v1 = vld [vmem:[#allocation44_spill] sm:$0xff] }
 0x191   :  { %526 = vmatpush2.msra.mxu1 %v2600_v3  ;;  %863 = vmatprep.subr.mxu0 %v2961_v8 }
 0x192   :  { %528 = vmatmul.mubr.f32.vlgmr.msra.gmra.mxu1 %v458_v5  ;;  %1459 = vmatprep.subr.msk.mxu1 %vm143_vm7, %v720_v46  ;;  %v3051_v5 = vld [vmem:[#allocation45_spill] sm:$0xff]  ;;  %v3052_v46 = vld [vmem:[#allocation46_spill] sm:$0xff] }
 0x193   :  { %1460 = vmatpush1.msk.msra.mxu1 %vm143_vm7, %v719_v4  ;;  %791 = vmatprep.mubr.f32.mxu1 %v2961_v8  ;;  %v3048_v4 = vld [vmem:[#allocation42_spill] sm:$0xff] }
 0x194   :  { %757 = vmatprep.subr.mxu1 %v718_v9  ;;  %864 = vmatpush1.msra.mxu0 %v1957_v14  ;;  %v3047_v9 = vld [vmem:[#allocation41_spill] sm:$0xff] }
 0x195   :  { %758 = vmatpush1.msra.mxu1 %v717_v11  ;;  %865 = vmatprep.subr.mxu0 %v2961_v8  ;;  %v3049_v11 = vld [vmem:[#allocation43_spill] sm:$0xff] }
 0x196   :  { %1461 = vmatmul.mubr.msk.f32.vlgmr.msra.gmra.mxu1 %vm139_vm10, %v1952_v13  ;;  %935 = vmatprep.subr.mxu1 %v2961_v8 }
 0x197   :  { %936 = vmatpush1.msra.mxu1 %v1726_v16  ;;  %866 = vmatpush1.msra.mxu0 %v1965_v15  ;;  %v3013_v16 = vld [vmem:[#allocation7_spill] sm:$0xff] }
 0x198   :  { %937 = vmatprep.subr.mxu1 %v2961_v8  ;;  %867 = vmatprep.subr.mxu0 %v2961_v8 }
 0x199   :  { %938 = vmatpush1.msra.mxu1 %v1735_v18  ;;  %868 = vmatpush1.msra.mxu0 %v1972_v17  ;;  %v3014_v18 = vld [vmem:[#allocation9_spill] sm:$0xff] }
 0x19a   :  { %939 = vmatprep.subr.mxu1 %v2961_v8  ;;  %869 = vmatprep.subr.mxu0 %v2961_v8 }
 0x19b   :  { %940 = vmatpush1.msra.mxu1 %v1741_v19  ;;  %870 = vmatpush1.msra.mxu0 %v1979_v20  ;;  %v3015_v19 = vld [vmem:[#allocation8_spill] sm:$0xff]  ;;  %v3020_v20 = vld [vmem:[#allocation14_spill] sm:$0xff] }
 0x19c   :  { %941 = vmatprep.subr.mxu1 %v2961_v8  ;;  %871 = vmatprep.subr.mxu0 %v2961_v8 }
 0x19d   :  { %942 = vmatpush1.msra.mxu1 %v1753_v21  ;;  %872 = vmatpush1.msra.mxu0 %v1986_v22  ;;  %v3016_v21 = vld [vmem:[#allocation11_spill] sm:$0xff] }
 0x19e   :  { %943 = vmatprep.subr.mxu1 %v2961_v8  ;;  %873 = vmatprep.subr.mxu0 %v2961_v8  ;;  %v3021_v22 = vld [vmem:[#allocation15_spill] sm:$0xff] }
 0x19f   :  { %944 = vmatpush1.msra.mxu1 %v1763_v23  ;;  %874 = vmatpush1.msra.mxu0 %v1993_v24  ;;  %v3017_v23 = vld [vmem:[#allocation10_spill] sm:$0xff]  ;;  %v3022_v24 = vld [vmem:[#allocation16_spill] sm:$0xff] }
 0x1a0   :  { %945 = vmatprep.subr.mxu1 %v2961_v8  ;;  %875 = vmatprep.subr.mxu0 %v2961_v8 }
 0x1a1   :  { %946 = vmatpush1.msra.mxu1 %v1775_v25  ;;  %876 = vmatpush1.msra.mxu0 %v2000_v26  ;;  %v3018_v25 = vld [vmem:[#allocation13_spill] sm:$0xff] }
 0x1a2   :  { %947 = vmatprep.subr.mxu1 %v2961_v8  ;;  %877 = vmatprep.subr.mxu0 %v2961_v8  ;;  %v3023_v26 = vld [vmem:[#allocation17_spill] sm:$0xff] }
 0x1a3   :  { %948 = vmatpush1.msra.mxu1 %v1785_v27  ;;  %878 = vmatpush1.msra.mxu0 %v2007_v29  ;;  %v3019_v27 = vld [vmem:[#allocation12_spill] sm:$0xff]  ;;  %v3024_v29 = vld [vmem:[#allocation18_spill] sm:$0xff] }
 0x1a4   :  { %949 = vmatprep.subr.mxu1 %v2961_v8  ;;  %879 = vmatprep.subr.mxu0 %v2961_v8 }
 0x1a5   :  { %950 = vmatpush1.msra.mxu1 %v1794_v28  ;;  %880 = vmatpush1.msra.mxu0 %v2014_v47  ;;  %v3025_v47 = vld [vmem:[#allocation19_spill] sm:$0xff] }
 0x1a6   :  { %951 = vmatprep.subr.mxu1 %v2961_v8  ;;  %881 = vmatprep.subr.mxu0 %v2961_v8 }
 0x1a7   :  { %952 = vmatpush1.msra.mxu1 %v1804_v30  ;;  %882 = vmatpush1.msra.mxu0 %v2021_v48  ;;  %v3026_v48 = vld [vmem:[#allocation20_spill] sm:$0xff] }
 0x1a8   :  { %953 = vmatprep.subr.mxu1 %v2961_v8  ;;  %883 = vmatprep.subr.mxu0 %v2961_v8 }
 0x1a9   :  { %954 = vmatpush1.msra.mxu1 %v1812_v31  ;;  %884 = vmatpush1.msra.mxu0 %v2028_v49  ;;  %v3027_v49 = vld [vmem:[#allocation21_spill] sm:$0xff] }
 0x1aa   :  { %955 = vmatprep.subr.mxu1 %v2961_v8  ;;  %885 = vmatprep.subr.mxu0 %v2961_v8 }
 0x1ab   :  { %956 = vmatpush1.msra.mxu1 %v1819_v32  ;;  %886 = vmatpush1.msra.mxu0 %v2035_v50  ;;  %v3028_v50 = vld [vmem:[#allocation22_spill] sm:$0xff] }
 0x1ac   :  { %957 = vmatprep.subr.mxu1 %v2961_v8  ;;  %887 = vmatprep.subr.mxu0 %v2961_v8 }
 0x1ad   :  { %958 = vmatpush1.msra.mxu1 %v1826_v33  ;;  %888 = vmatpush1.msra.mxu0 %v2042_v51  ;;  %v3029_v51 = vld [vmem:[#allocation23_spill] sm:$0xff] }
 0x1ae   :  { %959 = vmatprep.subr.mxu1 %v2961_v8  ;;  %889 = vmatprep.subr.mxu0 %v2961_v8 }
 0x1af   :  { %960 = vmatpush1.msra.mxu1 %v1833_v34  ;;  %890 = vmatpush1.msra.mxu0 %v2049_v52  ;;  %v3030_v52 = vld [vmem:[#allocation24_spill] sm:$0xff] }
 0x1b0   :  { %961 = vmatprep.subr.mxu1 %v2961_v8  ;;  %891 = vmatprep.subr.mxu0 %v2961_v8 }
 0x1b1   :  { %962 = vmatpush1.msra.mxu1 %v1840_v35  ;;  %892 = vmatpush1.msra.mxu0 %v2056_v53  ;;  %v3031_v53 = vld [vmem:[#allocation25_spill] sm:$0xff] }
 0x1b2   :  { %963 = vmatprep.subr.mxu1 %v2961_v8  ;;  %893 = vmatprep.subr.mxu0 %v2961_v8 }
 0x1b3   :  { %964 = vmatpush1.msra.mxu1 %v1847_v36  ;;  %894 = vmatpush1.msra.mxu0 %v2063_v54  ;;  %v3032_v54 = vld [vmem:[#allocation26_spill] sm:$0xff] }
 0x1b4   :  { %965 = vmatprep.subr.mxu1 %v2961_v8  ;;  %903 = vmatprep.subr.mxu0 %v2961_v8 }
 0x1b5   :  { %966 = vmatpush1.msra.mxu1 %v1854_v37  ;;  %904 = vmatpush2.msra.mxu0 %v2070_v55  ;;  %v3033_v55 = vld [vmem:[#allocation27_spill] sm:$0xff] }
 0x1b6   :  { %975 = vmatprep.subr.mxu1 %v2961_v8  ;;  %905 = vmatprep.subr.mxu0 %v2961_v8 }
 0x1b7   :  { %976 = vmatpush2.msra.mxu1 %v1861_v38  ;;  %906 = vmatpush2.msra.mxu0 %v2077_v56  ;;  %v3034_v56 = vld [vmem:[#allocation28_spill] sm:$0xff] }
 0x1b8   :  { %977 = vmatprep.subr.mxu1 %v2961_v8  ;;  %907 = vmatprep.subr.mxu0 %v2961_v8 }
 0x1b9   :  { %978 = vmatpush2.msra.mxu1 %v1868_v39  ;;  %908 = vmatpush2.msra.mxu0 %v2084_v57  ;;  %v3035_v57 = vld [vmem:[#allocation29_spill] sm:$0xff] }
 0x1ba   :  { %979 = vmatprep.subr.mxu1 %v2961_v8  ;;  %909 = vmatprep.subr.mxu0 %v2961_v8 }
 0x1bb   :  { %980 = vmatpush2.msra.mxu1 %v1875_v40  ;;  %910 = vmatpush2.msra.mxu0 %v2091_v58  ;;  %v3036_v58 = vld [vmem:[#allocation30_spill] sm:$0xff] }
 0x1bc   :  { %981 = vmatprep.subr.mxu1 %v2961_v8  ;;  %911 = vmatprep.subr.mxu0 %v2961_v8 }
 0x1bd   :  { %982 = vmatpush2.msra.mxu1 %v1882_v41  ;;  %912 = vmatpush2.msra.mxu0 %v2098_v59  ;;  %v3037_v59 = vld [vmem:[#allocation31_spill] sm:$0xff] }
 0x1be   :  { %983 = vmatprep.subr.mxu1 %v2961_v8  ;;  %913 = vmatprep.subr.mxu0 %v2961_v8 }
 0x1bf   :  { %984 = vmatpush2.msra.mxu1 %v1889_v42  ;;  %914 = vmatpush2.msra.mxu0 %v2105_v60  ;;  %v3038_v60 = vld [vmem:[#allocation32_spill] sm:$0xff] }
 0x1c0   :  { %985 = vmatprep.subr.mxu1 %v2961_v8  ;;  %915 = vmatprep.subr.mxu0 %v2961_v8 }
 0x1c1   :  { %986 = vmatpush2.msra.mxu1 %v1896_v43  ;;  %916 = vmatpush2.msra.mxu0 %v2112_v61  ;;  %v3039_v61 = vld [vmem:[#allocation33_spill] sm:$0xff] }
 0x1c2   :  { %987 = vmatprep.subr.mxu1 %v2961_v8  ;;  %917 = vmatprep.subr.mxu0 %v2961_v8 }
 0x1c3   :  { %988 = vmatpush2.msra.mxu1 %v1903_v44  ;;  %918 = vmatpush2.msra.mxu0 %v2121_v62  ;;  %v3040_v62 = vld [vmem:[#allocation34_spill] sm:$0xff] }
 0x1c4   :  { %989 = vmatprep.subr.mxu1 %v2961_v8  ;;  %919 = vmatprep.subr.mxu0 %v2961_v8 }
 0x1c5   :  { %990 = vmatpush2.msra.mxu1 %v1910_v45  ;;  %920 = vmatpush2.msra.mxu0 %v2128_v63  ;;  %v3041_v63 = vld [vmem:[#allocation35_spill] sm:$0xff] }
 0x1c6   :  { %991 = vmatprep.subr.mxu1 %v2961_v8  ;;  %921 = vmatprep.subr.mxu0 %v2961_v8 }
 0x1c7   :  { %992 = vmatpush2.msra.mxu1 %v3013_v16  ;;  %922 = vmatpush2.msra.mxu0 %v3014_v18  ;;  %v3053_v16 = vld [vmem:[#allocation47_spill] sm:$0xff]  ;;  %v3054_v18 = vld [vmem:[#allocation48_spill] sm:$0xff] }
 0x1c8   :  { %993 = vmatprep.subr.mxu1 %v2961_v8  ;;  %923 = vmatprep.subr.mxu0 %v2961_v8 }
 0x1c9   :  { %994 = vmatpush2.msra.mxu1 %v3015_v19  ;;  %924 = vmatpush2.msra.mxu0 %v3016_v21  ;;  %v3055_v19 = vld [vmem:[#allocation49_spill] sm:$0xff]  ;;  %v3056_v21 = vld [vmem:[#allocation50_spill] sm:$0xff] }
 0x1ca   :  { %995 = vmatprep.subr.mxu1 %v2961_v8  ;;  %925 = vmatprep.subr.mxu0 %v2961_v8 }
 0x1cb   :  { %996 = vmatpush2.msra.mxu1 %v3017_v23  ;;  %926 = vmatpush2.msra.mxu0 %v3018_v25  ;;  %v3057_v23 = vld [vmem:[#allocation51_spill] sm:$0xff]  ;;  %v3058_v25 = vld [vmem:[#allocation52_spill] sm:$0xff] }
 0x1cc   :  { %997 = vmatprep.subr.mxu1 %v2961_v8  ;;  %1038 = vmatprep.subr.mxu0 %v2961_v8 }
 0x1cd   :  { %998 = vmatpush2.msra.mxu1 %v3019_v27  ;;  %v3059_v27 = vld [vmem:[#allocation53_spill] sm:$0xff] }
 0x1ce   :  { %1142 = vmatprep.subr.mxu1 %v2961_v8 }
 0x217   :  { %v425_v28 = vpop.f32.mrf.mxu0 }
 0x219   :  { %v427_v30 = vpop.f32.mrf.mxu0 }
 0x21a   :  { %v353_v31 = vpop.f32.mrf.mxu1  ;;  %v3061_v30 = vld [vmem:[#allocation55_spill] sm:$0xff] }
 0x21b   :  { %v426_v34 = vadd.f32 %v425_v28, %v353_v31  ;;  %v3060_v28 = vld [vmem:[#allocation54_spill] sm:$0xff]  ;;  %v3062_v31 = vld [vmem:[#allocation56_spill] sm:$0xff] }
 0x21c   :  { %v355_v32 = vpop.f32.mrf.mxu1 }
 0x21d   :  { %v3063_v32 = vld [vmem:[#allocation57_spill] sm:$0xff] }
 0x250   :  { %v634_v33 = vpop.f32.mrf.mxu0 }
 0x252   :  { %v529_v35 = vpop.f32.mrf.mxu1  ;;  %v636_v36 = vpop.f32.mrf.mxu0 }
 0x253   :  { %v533_v37 = vadd.f32 %v529_v35, %v426_v34  ;;  %v3065_v34 = vld [vmem:[#allocation59_spill] sm:$0xff]  ;;  %v3066_v35 = vld [vmem:[#allocation60_spill] sm:$0xff]  ;;  %v3067_v36 = vld [vmem:[#allocation61_spill] sm:$0xff] }
 0x254   :  { %v531_v38 = vpop.f32.mrf.mxu1 }
 0x255   :  { %v638_v39 = vadd.f32 %v634_v33, %v533_v37  ;;  %v3064_v33 = vld [vmem:[#allocation58_spill] sm:$0xff]  ;;  %v3069_v38 = vld [vmem:[#allocation63_spill] sm:$0xff] }
 0x256   :  { %v793_v40 = vpop.f32.mrf.mxu1  ;;  %v3068_v37 = vld [vmem:[#allocation62_spill] sm:$0xff] }
 0x257   :  { %640 = vst.msk [vmem:[#allocation3] sm:$0x1] %vm639_vm11, %v638_v39  ;;  %v794_v41 = vadd.f32 %v793_v40, %v2175_v10  ;;  %v3070_v40 = vld [vmem:[#allocation64_spill] sm:$0xff] }
 0x258   :  { %v795_v42 = vpop.f32.mrf.mxu1 }
 0x259   :  { %v796_v43 = vadd.f32 %v795_v42, %v2175_v10  ;;  %v2729_v44 = vmax.f32 %v794_v41, 0.0  ;;  %v3042_v10 = vld [vmem:[#allocation36_spill] sm:$0xff] }
 0x25b   :  { %v799_v45 = vmax.f32 %v796_v43, 0.0  ;;  %v858_v15 = vrot.slane %v2729_v44, 1  ;;  %v1137_v39 = vrot.slane %v2729_v44, 3  ;;  %v1033_v41 = vrot.slane %v2729_v44, 2 }
 0x25d   :  { %1491 = vmatprep.mubr.msk.f32.mxu1 %vm102_vm8, %v799_v45  ;;  %v859_v13 = vrot.slane %v799_v45, 1  ;;  %v1138_v14 = vrot.slane %v799_v45, 3  ;;  %v1034_v17 = vrot.slane %v799_v45, 2 }
 0x25e   :  { %1000 = vmatmul.mubr.f32.vlgmr.msra.gmra.mxu1 %v2729_v44 }
 0x25f   :  { %1143 = vmatpush1.msra.mxu1 %v2212_v0  ;;  %1490 = vmatprep.mubr.msk.f32.mxu0 %vm102_vm8, %v859_v13  ;;  %v3044_v0 = vld [vmem:[#allocation38_spill] sm:$0xff] }
 0x260   :  { %1144 = vmatprep.subr.mxu1 %v2961_v8  ;;  %1549 = vmatprep.mubr.msk.f32.mxu1 %vm102_vm8, %v1138_v14 }
 0x261   :  { %928 = vmatmul.mubr.f32.vlgmr.msra.gmra.mxu0 %v858_v15  ;;  %1145 = vmatpush1.msra.mxu1 %v2219_v7  ;;  %v3045_v7 = vld [vmem:[#allocation39_spill] sm:$0xff] }
 0x262   :  { %1039 = vmatpush1.msra.mxu0 %v2227_v6  ;;  %1520 = vmatprep.mubr.msk.f32.mxu0 %vm102_vm8, %v1034_v17  ;;  %v3046_v6 = vld [vmem:[#allocation40_spill] sm:$0xff] }
 0x263   :  { %1040 = vmatprep.subr.mxu0 %v2961_v8  ;;  %1146 = vmatprep.subr.mxu1 %v2961_v8 }
 0x264   :  { %1041 = vmatpush1.msra.mxu0 %v3020_v20  ;;  %1147 = vmatpush1.msra.mxu1 %v3021_v22 }
 0x265   :  { %1042 = vmatprep.subr.mxu0 %v2961_v8  ;;  %1148 = vmatprep.subr.mxu1 %v2961_v8 }
 0x266   :  { %1043 = vmatpush1.msra.mxu0 %v3022_v24  ;;  %1149 = vmatpush1.msra.mxu1 %v3023_v26 }
 0x267   :  { %1044 = vmatprep.subr.mxu0 %v2961_v8  ;;  %1150 = vmatprep.subr.mxu1 %v2961_v8 }
 0x268   :  { %1045 = vmatpush1.msra.mxu0 %v3024_v29  ;;  %1151 = vmatpush1.msra.mxu1 %v3025_v47 }
 0x269   :  { %1046 = vmatprep.subr.mxu0 %v2961_v8  ;;  %1152 = vmatprep.subr.mxu1 %v2961_v8 }
 0x26a   :  { %1047 = vmatpush1.msra.mxu0 %v3026_v48  ;;  %1153 = vmatpush1.msra.mxu1 %v3027_v49  ;;  %v1261_v49 = vld [vmem:[%s2889_s7 + $0x18] sm:$0xff] }
 0x26b   :  { %1048 = vmatprep.subr.mxu0 %v2961_v8  ;;  %1154 = vmatprep.subr.mxu1 %v2961_v8 }
 0x26c   :  { %1049 = vmatpush1.msra.mxu0 %v3028_v50  ;;  %1155 = vmatpush1.msra.mxu1 %v3029_v51  ;;  %v1260_v50 = vld [vmem:[%s2889_s7 + $0x10] sm:$0xff]  ;;  %v1259_v51 = vld [vmem:[%s2889_s7 + $0x8] sm:$0xff] }
 0x26d   :  { %1050 = vmatprep.subr.mxu0 %v2961_v8  ;;  %1156 = vmatprep.subr.mxu1 %v2961_v8 }
 0x26e   :  { %1051 = vmatpush1.msra.mxu0 %v3030_v52  ;;  %1157 = vmatpush1.msra.mxu1 %v3031_v53  ;;  %v1258_v52 = vld [vmem:[%s2889_s7] sm:$0xff] }
 0x26f   :  { %1052 = vmatprep.subr.mxu0 %v2961_v8  ;;  %1158 = vmatprep.subr.mxu1 %v2961_v8 }
 0x270   :  { %1053 = vmatpush1.msra.mxu0 %v3032_v54  ;;  %1159 = vmatpush1.msra.mxu1 %v3033_v55 }
 0x271   :  { %1054 = vmatprep.subr.mxu0 %v2961_v8  ;;  %1160 = vmatprep.subr.mxu1 %v2961_v8 }
 0x272   :  { %1055 = vmatpush1.msra.mxu0 %v3034_v56  ;;  %1161 = vmatpush1.msra.mxu1 %v3035_v57 }
 0x273   :  { %1056 = vmatprep.subr.mxu0 %v2961_v8  ;;  %1162 = vmatprep.subr.mxu1 %v2961_v8 }
 0x274   :  { %1057 = vmatpush1.msra.mxu0 %v3036_v58  ;;  %1163 = vmatpush1.msra.mxu1 %v3037_v59 }
 0x275   :  { %1058 = vmatprep.subr.mxu0 %v2961_v8  ;;  %1164 = vmatprep.subr.mxu1 %v2961_v8 }
 0x276   :  { %1059 = vmatpush1.msra.mxu0 %v3038_v60  ;;  %1165 = vmatpush1.msra.mxu1 %v3039_v61 }
 0x277   :  { %1060 = vmatprep.subr.mxu0 %v2961_v8  ;;  %1166 = vmatprep.subr.mxu1 %v2961_v8 }
 0x278   :  { %1061 = vmatpush1.msra.mxu0 %v3040_v62  ;;  %1167 = vmatpush1.msra.mxu1 %v3041_v63  ;;  %v1551_v63 = vld [vmem:[%s2887_s5] ss:$0 sm:$0xff]  ;;  %s1586_s5 = scalar_lea.vmem %s1352_s26, 32 }
 0x279   :  { %1062 = vmatprep.subr.mxu0 %v2961_v8  ;;  %1168 = vmatprep.subr.mxu1 %v2961_v8  ;;  %p1587_p0 = scmp.ne.s32.totalorder %s1352_s26, %s1586_s5  ;;  %p1592_p2 = scmp.lt.s32.totalorder %s1586_s5, %s1586_s5 }
 0x27a   :  { %1063 = vmatpush1.msra.mxu0 %v3042_v10  ;;  %1169 = vmatpush1.msra.mxu1 %v3043_v2 }
 0x27b   :  { %1064 = vmatprep.subr.mxu0 %v2961_v8  ;;  %1170 = vmatprep.subr.mxu1 %v2961_v8  ;;  %p1593_p3 = por %p1592_p2, %p1591_p1 }
 0x27c   :  { %1065 = vmatpush1.msra.mxu0 %v3044_v0  ;;  %1171 = vmatpush1.msra.mxu1 %v3045_v7 }
 0x27d   :  { %1066 = vmatprep.subr.mxu0 %v2961_v8  ;;  %1172 = vmatprep.subr.mxu1 %v2961_v8  ;;  %p1594_p4 = pnand %p1593_p3, %p1587_p0 }
 0x27e   :  { %1067 = vmatpush1.msra.mxu0 %v3046_v6  ;;  %1173 = vmatpush1.msra.mxu1 %v3047_v9  ;;  %v1553_v6 = vld [vmem:[%s2890_s8] ss:$0 sm:$0xff] }
 0x27f   :  { %1068 = vmatprep.subr.mxu0 %v2961_v8  ;;  %1182 = vmatprep.subr.mxu1 %v2961_v8 }
 0x280   :  { %1069 = vmatpush1.msra.mxu0 %v3048_v4  ;;  %1183 = vmatpush2.msra.mxu1 %v3049_v11 }
 0x281   :  { %1078 = vmatprep.subr.mxu0 %v2961_v8  ;;  %1184 = vmatprep.subr.mxu1 %v2961_v8 }
 0x282   :  { %1079 = vmatpush2.msra.mxu0 %v3050_v1  ;;  %1185 = vmatpush2.msra.mxu1 %v3051_v5 }
 0x283   :  { %1080 = vmatprep.subr.mxu0 %v2961_v8  ;;  %1186 = vmatprep.subr.mxu1 %v2961_v8 }
 0x284   :  { %1081 = vmatpush2.msra.mxu0 %v3052_v46  ;;  %1187 = vmatpush2.msra.mxu1 %v3053_v16 }
 0x285   :  { %1082 = vmatprep.subr.mxu0 %v2961_v8  ;;  %1188 = vmatprep.subr.mxu1 %v2961_v8 }
 0x286   :  { %1083 = vmatpush2.msra.mxu0 %v3054_v18  ;;  %1189 = vmatpush2.msra.mxu1 %v3055_v19 }
 0x287   :  { %1084 = vmatprep.subr.mxu0 %v2961_v8  ;;  %1190 = vmatprep.subr.mxu1 %v2961_v8 }
 0x288   :  { %1085 = vmatpush2.msra.mxu0 %v3056_v21  ;;  %1191 = vmatpush2.msra.mxu1 %v3057_v23 }
 0x289   :  { %1086 = vmatprep.subr.mxu0 %v2961_v8  ;;  %1192 = vmatprep.subr.mxu1 %v2961_v8 }
 0x28a   :  { %1087 = vmatpush2.msra.mxu0 %v3058_v25  ;;  %1193 = vmatpush2.msra.mxu1 %v3059_v27 }
 0x28b   :  { %1088 = vmatprep.subr.mxu0 %v2961_v8  ;;  %1194 = vmatprep.subr.mxu1 %v2961_v8 }
 0x28c   :  { %1089 = vmatpush2.msra.mxu0 %v3060_v28  ;;  %1195 = vmatpush2.msra.mxu1 %v3061_v30 }
 0x28d   :  { %1090 = vmatprep.subr.mxu0 %v2961_v8  ;;  %1196 = vmatprep.subr.mxu1 %v2961_v8 }
 0x28e   :  { %1091 = vmatpush2.msra.mxu0 %v3062_v31  ;;  %1197 = vmatpush2.msra.mxu1 %v3063_v32 }
 0x28f   :  { %1092 = vmatprep.subr.mxu0 %v2961_v8  ;;  %1198 = vmatprep.subr.mxu1 %v2961_v8 }
 0x290   :  { %1093 = vmatpush2.msra.mxu0 %v3064_v33  ;;  %1199 = vmatpush2.msra.mxu1 %v3065_v34 }
 0x291   :  { %1094 = vmatprep.subr.mxu0 %v2961_v8  ;;  %1200 = vmatprep.subr.mxu1 %v2961_v8 }
 0x292   :  { %1095 = vmatpush2.msra.mxu0 %v3066_v35  ;;  %1201 = vmatpush2.msra.mxu1 %v3067_v36 }
 0x293   :  { %1096 = vmatprep.subr.mxu0 %v2961_v8  ;;  %1202 = vmatprep.subr.mxu1 %v2961_v8 }
 0x294   :  { %1097 = vmatpush2.msra.mxu0 %v3068_v37  ;;  %1203 = vmatpush2.msra.mxu1 %v3069_v38 }
 0x295   :  { %1098 = vmatprep.subr.mxu0 %v2961_v8  ;;  %1204 = vmatprep.subr.mxu1 %v2961_v8 }
 0x296   :  { %1099 = vmatpush2.msra.mxu0 %v2585_v12  ;;  %1205 = vmatpush2.msra.mxu1 %v3070_v40 }
 0x297   :  { %1100 = vmatprep.subr.mxu0 %v2961_v8  ;;  %1207 = vmatmul.mubr.f32.vlgmr.msra.gmra.mxu1 %v1137_v39 }
 0x298   :  { %1101 = vmatpush2.msra.mxu0 %v2600_v3  ;;  %v1550_v3 = vld [vmem:[%s2886_s4] ss:$0 sm:$0xff] }
 0x299   :  { %1103 = vmatmul.mubr.f32.vlgmr.msra.gmra.mxu0 %v1033_v41  ;;  %1560 = vmatprep.subr.mxu0 %v2961_v8 }
 0x29a   :  { %1561 = vmatpush3.msra.mxu0 %v1261_v49  ;;  %1568 = vmatprep.mubr.msk.f32.mxu0 %vm1618_vm13, %v2961_v8 }
 0x29b   :  { %1562 = vmatprep.subr.mxu0 %v2961_v8 }
 0x29c   :  { %1563 = vmatpush3.msra.mxu0 %v1260_v50 }
 0x29d   :  { %1564 = vmatprep.subr.mxu0 %v2961_v8 }
 0x29e   :  { %1565 = vmatpush3.msra.mxu0 %v1259_v51 }
 0x29f   :  { %1566 = vmatprep.subr.mxu0 %v2961_v8  ;;  %v1552_v8 = vld [vmem:[%s2888_s6] ss:$0 sm:$0xff] }
 0x2a0   :  { %1567 = vmatpush3.msra.mxu0 %v1258_v52 }
 0x31e   :  { %v1001_v42 = vpop.f32.mrf.mxu1 }
 0x320   :  { %v1003_v43 = vpop.f32.mrf.mxu1 }
 0x321   :  { %v929_v45 = vpop.f32.mrf.mxu0 }
 0x322   :  { %v1002_v15 = vadd.f32 %v1001_v42, %v929_v45 }
 0x323   :  { %v931_v13 = vpop.f32.mrf.mxu0 }
 0x357   :  { %v1208_v14 = vpop.f32.mrf.mxu1 }
 0x359   :  { %v1104_v17 = vpop.f32.mrf.mxu0  ;;  %v1210_v12 = vpop.f32.mrf.mxu1 }
 0x35a   :  { %v1108_v20 = vadd.f32 %v1104_v17, %v1002_v15 }
 0x35b   :  { %v1106_v22 = vpop.f32.mrf.mxu0 }
 0x35c   :  { %v1212_v24 = vadd.f32 %v1208_v14, %v1108_v20 }
 0x35e   :  { %1213 = vst.msk [vmem:[#allocation3 + $0x1] sm:$0x1] %vm639_vm11, %v1212_v24 }
 0x365   :  { %v1214_v44 = vld [vmem:[#allocation3] sm:$0x3] }
 0x366   :  { %v1222_v26 = vadd.f32 %v1550_v3, %v1214_v44 }
 0x368   :  { %v1224_v29 = vsel %vm1223_vm12, %v1222_v26, 0.0  ;;  %v1229_v47 = vmul.f32 %v1222_v26, %v1222_v26 }
 0x369   :  { %1225 = vadd.xlane.f32.xlu0 %v1224_v29 }
 0x36a   :  { %v1230_v48 = vsel %vm1223_vm12, %v1229_v47, 0.0 }
 0x36b   :  { %1231 = vadd.xlane.f32.xlu1 %v1230_v48 }
 0x3f2   :  { %v1226_v53 = vpop.xlane.xlu0 %1225 }
 0x3f3   :  { %v1228_v54 = vmul.f32 0.03125, %v1226_v53 }
 0x3f4   :  { %v1232_v55 = vpop.xlane.xlu1 %1231 }
 0x3f5   :  { %v1234_v56 = vmul.f32 %v1228_v54, %v1228_v54  ;;  %v1233_v57 = vmul.f32 0.03125, %v1232_v55  ;;  %v1237_v61 = vsub.f32 %v1222_v26, %v1228_v54 }
 0x3f7   :  { %v1235_v58 = vsub.f32 %v1233_v57, %v1234_v56 }
 0x3f9   :  { %v1236_v59 = vmax.f32 %v1235_v58, 0.0 }
 0x3fb   :  { %v1238_v60 = vadd.f32 1e-05, %v1236_v59 }
 0x3fd   :  { %1584 = vrsqrt.f32 %v1238_v60 }
 0x40a   :  { %v1585_v62 = vpop.eup %1584 }
 0x40b   :  { %v1240_v10 = vmul.f32 %v1585_v62, %v1237_v61 }
 0x40d   :  { %v1248_v2 = vmul.f32 %v1551_v63, %v1240_v10 }
 0x40f   :  { %v1256_v0 = vadd.f32 %v1552_v8, %v1248_v2 }
 0x411   :  { %v1257_v7 = vmax.f32 %v1256_v0, 0.0 }
 0x413   :  { %1569 = vmatmul.mubr.msk.f32.vlgmr.msra.gmra.mxu0 %vm1269_vm14, %v1257_v7 }
 0x4d3   :  { %v1339_v9 = vpop.f32.mrf.mxu0 }
 0x4d4   :  { %v1340_v4 = vadd.f32 %v1553_v6, %v1339_v9 }
 0x4d5   :  { %v1570_v11 = vpop.f32.mrf.mxu0 }
 0x4d6   :  { %1344 = vst.msk [vmem:[#allocation4] sm:$0x3] %vm1343_vm15, %v1340_v4 }
 0x4d7   :  { %1597 = shalt.err (!%p1594_p4)
}
 0x4d8   :  { %1354 = dma.vmem_to_hbm [thread:$0]  %s1352_s26, 32, %s2891_s9, [#allocation5]  }
 0x4d9   :  { %1606 = dma.done.wait [#allocation5], 32  }
 0x4da   :  { %1607 = vsyncadd [#allocation5], 4294967264 }
 0x4db   :  { %1358 = vsyncpa [#allocation5], 1 }

</bundles_post_ra>
